<compile_context>
chip_gen: v7x
topology: tpu7x:2x2x1
jax: 0.10.0
libtpu: 0.0.40
codegen_flags: <defaults>
</compile_context>

<pallas_src>
import functools

import jax
import jax.numpy as jnp
from jax import lax
from jax.experimental import pallas as pl
from jax.experimental.pallas import tpu as pltpu

LN_EPS = 1e-5  # torch nn.LayerNorm default


# ----------------------------- in-kernel helpers -----------------------------

def _layernorm(x, g, b):
    # x: (N, C) f32, g/b: (1, C) f32
    mu = jnp.mean(x, axis=-1, keepdims=True)
    var = jnp.mean((x - mu) ** 2, axis=-1, keepdims=True)
    return (x - mu) * lax.rsqrt(var + LN_EPS) * g + b


def _gelu_tanh(x):
    # tanh-form GELU (EUP tanh); max abs deviation from exact erf-GELU ~1e-3,
    # well inside the bf16 comparison tolerance.
    c = 0.7978845608028654  # sqrt(2/pi)
    return 0.5 * x * (1.0 + jnp.tanh(c * (x + 0.044715 * x * x * x)))


# ------------------------------- Pallas kernel --------------------------------

def _block_kernel(num_heads,
                  x_ref,
                  g1_ref, b1_ref, wqkv_ref, wp_ref, bp_ref,
                  g2_ref, b2_ref, w1_ref, bb1_ref, w2_ref, bb2_ref,
                  gf_ref, bf_ref,
                  o_ref):
    """One transformer block per grid step. Grid = (batch, layer); the activation
    is carried across the layer axis in o_ref (resident VMEM accumulator)."""
    layer = pl.program_id(1)
    n_layers = pl.num_programs(1)
    bf16 = jnp.bfloat16

    # Initialize the carried activation from the input on the first layer.
    @pl.when(layer == 0)
    def _():
        o_ref[0] = x_ref[0]

    x = o_ref[0]                       # (N, C) f32
    N, C = x.shape
    hd = C // num_heads

    # --- Attention branch: x + Proj(MHSA(LN1(x))) ---
    hln = _layernorm(x, g1_ref[0], b1_ref[0])                            # (N, C) f32
    # Fused QKV projection: (N, C) @ (C, 3C); attention scale pre-folded into Q cols.
    qkv = jnp.dot(hln.astype(bf16), wqkv_ref[0],
                  preferred_element_type=jnp.float32)                    # (N, 3C) f32

    heads = []
    for h in range(num_heads):         # static unroll over heads
        q = qkv[:, h * hd:(h + 1) * hd].astype(bf16)                     # (N, hd)
        k = qkv[:, C + h * hd:C + (h + 1) * hd].astype(bf16)             # (N, hd)
        v = qkv[:, 2 * C + h * hd:2 * C + (h + 1) * hd].astype(bf16)     # (N, hd)

        # Scores: contraction over hd on both operands (no k.T materialization).
        s = lax.dot_general(q, k, (((1,), (1,)), ((), ())),
                            preferred_element_type=jnp.float32)          # (N, N) f32
        s = s - jnp.max(s, axis=-1, keepdims=True)
        p = jnp.exp(s)
        p = p * pl.reciprocal(jnp.sum(p, axis=-1, keepdims=True), approx=True)

        heads.append(jnp.dot(p.astype(bf16), v,
                             preferred_element_type=jnp.float32))        # (N, hd)

    ctx = jnp.concatenate(heads, axis=-1)                                # (N, C)
    attn = jnp.dot(ctx.astype(bf16), wp_ref[0],
                   preferred_element_type=jnp.float32) + bp_ref[0]       # (N, C)
    x = x + attn

    # --- MLP branch: x + FC2(GELU(FC1(LN2(x)))) ---
    h2 = _layernorm(x, g2_ref[0], b2_ref[0])
    f = jnp.dot(h2.astype(bf16), w1_ref[0],
                preferred_element_type=jnp.float32) + bb1_ref[0]         # (N, hidden)
    f = _gelu_tanh(f)
    f = jnp.dot(f.astype(bf16), w2_ref[0],
                preferred_element_type=jnp.float32) + bb2_ref[0]         # (N, C)
    x = x + f

    # Carry / finalize.
    @pl.when(layer != n_layers - 1)
    def _():
        o_ref[0] = x

    @pl.when(layer == n_layers - 1)
    def _():
        o_ref[0] = _layernorm(x, gf_ref[...], bf_ref[...])   # final x_norm fused in


# ------------------------------- host wrapper ----------------------------------

_WEIGHT_KEYS = ('g1', 'b1', 'wqkv', 'wp', 'bp',
                'g2', 'b2', 'w1', 'bb1', 'w2', 'bb2',
                'gf', 'bf')


def _layer_spec(shape):
    """Per-layer weight: stacked (depth, ...) array, stream one layer per grid step."""
    nd = len(shape)
    block = (1,) + tuple(shape[1:])
    return pl.BlockSpec(block, lambda b, l, _nd=nd: (l,) + (0,) * (_nd - 1))


def _full_spec(shape):
    """Layer-independent weight: full block, resident across the whole grid."""
    nd = len(shape)
    return pl.BlockSpec(tuple(shape), lambda b, l, _nd=nd: (0,) * _nd)


def transformer_forward_pallas(x, packed, num_heads):
    B, N, C = x.shape
    depth = packed['wqkv'].shape[0]

    weights = [packed[k] for k in _WEIGHT_KEYS]
    in_specs = [pl.BlockSpec((1, N, C), lambda b, l: (b, 0, 0))]
    for k, w in zip(_WEIGHT_KEYS, weights):
        if k in ('gf', 'bf'):
            in_specs.append(_full_spec(w.shape))
        else:
            in_specs.append(_layer_spec(w.shape))

    return pl.pallas_call(
        functools.partial(_block_kernel, num_heads),
        out_shape=jax.ShapeDtypeStruct((B, N, C), jnp.float32),
        grid_spec=pltpu.PrefetchScalarGridSpec(
            num_scalar_prefetch=0,
            grid=(B, depth),                 # layer axis innermost (activation carry)
            in_specs=in_specs,
            out_specs=pl.BlockSpec((1, N, C), lambda b, l: (b, 0, 0)),
        ),
        compiler_params=pltpu.CompilerParams(
            dimension_semantics=("parallel", "arbitrary"),
            vmem_limit_bytes=48 * 1024 * 1024,
        ),
    )(x, *weights)


# ----------------------------- parameter creation ------------------------------

def init_params(key, depth, embed_dim, num_heads, mlp_ratio):
    """Deterministic synthetic init mirroring TransformerEncoder._init_weights:
    Linear weights ~ trunc_normal(std=0.02), Linear biases = 0, LN weight=1, bias=0.
    Returned in torch layout ((out, in) weights, f32)."""
    C = embed_dim
    hidden = int(C * mlp_ratio)

    def trunc(k, shape, std=0.02):
        return (std * jax.random.truncated_normal(k, -2.0, 2.0, shape)).astype(jnp.float32)

    blocks = []
    for i in range(depth):
        ks = jax.random.split(jax.random.fold_in(key, i), 4)
        blocks.append(dict(
            wqkv=trunc(ks[0], (3 * C, C)),            # qkv (bias=False)
            wproj=trunc(ks[1], (C, C)),
            w1=trunc(ks[2], (hidden, C)),
            w2=trunc(ks[3], (C, hidden)),
            g1=jnp.ones((C,), jnp.float32), b1=jnp.zeros((C,), jnp.float32),
            g2=jnp.ones((C,), jnp.float32), b2=jnp.zeros((C,), jnp.float32),
            bproj=jnp.zeros((C,), jnp.float32),
            bb1=jnp.zeros((hidden,), jnp.float32),
            bb2=jnp.zeros((C,), jnp.float32),
        ))
    final_ln = (jnp.ones((C,), jnp.float32), jnp.zeros((C,), jnp.float32))
    return blocks, final_ln


def pack_params(blocks, final_ln, num_heads):
    """Repack torch-layout f32 params into the kernel layout:
    stacked (depth, ...) arrays, weights transposed to (in, out) and cast to bf16,
    1/sqrt(head_dim) scale folded into the Q columns of the fused QKV weight."""
    C = blocks[0]['wqkv'].shape[1]
    hd = C // num_heads
    scale = hd ** (-0.5)

    wqkv, wp, w1, w2 = [], [], [], []
    g1, b1, g2, b2, bp, bb1, bb2 = [], [], [], [], [], [], []
    for p in blocks:
        wt = p['wqkv'].T                          # (C, 3C); columns = [Q | K | V], head-major
        wt = wt.at[:, :C].multiply(scale)         # fold attention scale into Q
        wqkv.append(wt.astype(jnp.bfloat16))
        wp.append(p['wproj'].T.astype(jnp.bfloat16))      # (C, C)
        w1.append(p['w1'].T.astype(jnp.bfloat16))         # (C, hidden)
        w2.append(p['w2'].T.astype(jnp.bfloat16))         # (hidden, C)
        g1.append(p['g1'][None]); b1.append(p['b1'][None])
        g2.append(p['g2'][None]); b2.append(p['b2'][None])
        bp.append(p['bproj'][None])
        bb1.append(p['bb1'][None]); bb2.append(p['bb2'][None])

    gf, bf = final_ln
    return dict(
        wqkv=jnp.stack(wqkv), wp=jnp.stack(wp), w1=jnp.stack(w1), w2=jnp.stack(w2),
        g1=jnp.stack(g1), b1=jnp.stack(b1), g2=jnp.stack(g2), b2=jnp.stack(b2),
        bp=jnp.stack(bp), bb1=jnp.stack(bb1), bb2=jnp.stack(bb2),
        gf=gf[None], bf=bf[None],
    )


# ----------------------------- pure-JAX reference -------------------------------

def reference_forward(x, blocks, final_ln, num_heads):
    """f32 reference mirroring the PyTorch module (dropout p=0 -> identity)."""
    B, N, C = x.shape
    hd = C // num_heads
    scale = hd ** (-0.5)

    def ln(z, g, b):
        mu = z.mean(-1, keepdims=True)
        var = ((z - mu) ** 2).mean(-1, keepdims=True)
        return (z - mu) / jnp.sqrt(var + LN_EPS) * g + b

    for p in blocks:
        h = ln(x, p['g1'], p['b1'])
        qkv = h @ p['wqkv'].T                                        # (B, N, 3C)
        qkv = qkv.reshape(B, N, 3, num_heads, hd).transpose(2, 0, 3, 1, 4)
        q, k, v = qkv[0], qkv[1], qkv[2]                             # (B, H, N, hd)
        attn = (q @ jnp.swapaxes(k, -2, -1)) * scale
        attn = jax.nn.softmax(attn, axis=-1)
        o = (attn @ v).transpose(0, 2, 1, 3).reshape(B, N, C)
        x = x + o @ p['wproj'].T + p['bproj']
        h2 = ln(x, p['g2'], p['b2'])
        f = h2 @ p['w1'].T + p['bb1']
        f = jax.nn.gelu(f, approximate=False)
        f = f @ p['w2'].T + p['bb2']
        x = x + f
    g, b = final_ln
    return ln(x, g, b)


# ------------------------------------ main --------------------------------------

if __name__ == "__main__":
    # Small shapes consistent with Transformer(embed_dim, depth, num_heads, mlp_ratio).
    B, N = 2, 16
    EMBED_DIM = 128
    DEPTH = 2
    NUM_HEADS = 4
    MLP_RATIO = 3.0

    key = jax.random.PRNGKey(0)
    kx, kp = jax.random.split(key)
    x = jax.random.normal(kx, (B, N, EMBED_DIM), dtype=jnp.float32)

    blocks, final_ln = init_params(kp, DEPTH, EMBED_DIM, NUM_HEADS, MLP_RATIO)
    packed = pack_params(blocks, final_ln, NUM_HEADS)

    fwd = jax.jit(functools.partial(transformer_forward_pallas, num_heads=NUM_HEADS))
    out = jax.block_until_ready(fwd(x, packed))

    ref = reference_forward(x, blocks, final_ln, NUM_HEADS)
    assert out.shape == (B, N, EMBED_DIM)
    max_err = float(jnp.max(jnp.abs(out - ref)))
    # bf16 matmul operands (f32 accumulation) + tanh-GELU => relaxed tolerance vs f32 ref.
    assert jnp.allclose(out, ref, atol=2e-2, rtol=2e-2), \
        f"Pallas output mismatch vs JAX reference (max abs err {max_err})"

    print("KERNEL_OK")
</pallas_src>

<mosaic_0001>
module attributes {stable_mosaic.version = 11 : i64} {
  func.func @_block_kernel(%arg0: i32, %arg1: i32, %arg2: memref<1x16x128xf32, #tpu.memory_space<vmem>>, %arg3: memref<1x1x128xf32, #tpu.memory_space<vmem>>, %arg4: memref<1x1x128xf32, #tpu.memory_space<vmem>>, %arg5: memref<1x128x384xbf16, #tpu.memory_space<vmem>>, %arg6: memref<1x128x128xbf16, #tpu.memory_space<vmem>>, %arg7: memref<1x1x128xf32, #tpu.memory_space<vmem>>, %arg8: memref<1x1x128xf32, #tpu.memory_space<vmem>>, %arg9: memref<1x1x128xf32, #tpu.memory_space<vmem>>, %arg10: memref<1x128x384xbf16, #tpu.memory_space<vmem>>, %arg11: memref<1x1x384xf32, #tpu.memory_space<vmem>>, %arg12: memref<1x384x128xbf16, #tpu.memory_space<vmem>>, %arg13: memref<1x1x128xf32, #tpu.memory_space<vmem>>, %arg14: memref<1x128xf32, #tpu.memory_space<vmem>>, %arg15: memref<1x128xf32, #tpu.memory_space<vmem>>, %arg16: memref<1x16x128xf32, #tpu.memory_space<vmem>>) attributes {dimension_semantics = [#tpu.dimension_semantics<parallel>, #tpu.dimension_semantics<arbitrary>], iteration_bounds = array<i64: 2, 2>, scalar_prefetch = 0 : i64, scratch_operands = 0 : i64, tpu.core_type = #tpu.core_type<tc>, window_params = [{transform_indices = @transform_0, window_bounds = array<i64: 1, 16, 128>}, {transform_indices = @transform_1, window_bounds = array<i64: 1, 1, 128>}, {transform_indices = @transform_2, window_bounds = array<i64: 1, 1, 128>}, {transform_indices = @transform_3, window_bounds = array<i64: 1, 128, 384>}, {transform_indices = @transform_4, window_bounds = array<i64: 1, 128, 128>}, {transform_indices = @transform_5, window_bounds = array<i64: 1, 1, 128>}, {transform_indices = @transform_6, window_bounds = array<i64: 1, 1, 128>}, {transform_indices = @transform_7, window_bounds = array<i64: 1, 1, 128>}, {transform_indices = @transform_8, window_bounds = array<i64: 1, 128, 384>}, {transform_indices = @transform_9, window_bounds = array<i64: 1, 1, 384>}, {transform_indices = @transform_10, window_bounds = array<i64: 1, 384, 128>}, {transform_indices = @transform_11, window_bounds = array<i64: 1, 1, 128>}, {pipeline_mode = #tpu.pipeline_mode<synchronous>, transform_indices = @transform_12, window_bounds = array<i64: 1, 128>}, {pipeline_mode = #tpu.pipeline_mode<synchronous>, transform_indices = @transform_13, window_bounds = array<i64: 1, 128>}, {transform_indices = @transform_14, window_bounds = array<i64: 1, 16, 128>}]} {
    %c0_i32 = arith.constant 0 : i32
    %0 = arith.cmpi eq, %arg1, %c0_i32 : i32
    %1 = arith.extui %0 : i1 to i32
    %c0_i32_0 = arith.constant 0 : i32
    %2 = arith.cmpi ne, %1, %c0_i32_0 : i32
    scf.if %2 {
      %c0_72 = arith.constant 0 : index
      %c0_73 = arith.constant 0 : index
      %c0_74 = arith.constant 0 : index
      %183 = vector.load %arg2[%c0_72, %c0_73, %c0_74] : memref<1x16x128xf32, #tpu.memory_space<vmem>>, vector<1x16x128xf32>
      %184 = vector.shape_cast %183 : vector<1x16x128xf32> to vector<16x128xf32>
      %c0_75 = arith.constant 0 : index
      %c0_76 = arith.constant 0 : index
      %c0_77 = arith.constant 0 : index
      %185 = vector.load %arg16[%c0_75, %c0_76, %c0_77] : memref<1x16x128xf32, #tpu.memory_space<vmem>>, vector<1x16x128xf32>
      %186 = vector.shape_cast %185 : vector<1x16x128xf32> to vector<16x128xf32>
      %187 = vector.shape_cast %184 : vector<16x128xf32> to vector<1x16x128xf32>
      tpu.vector_store %arg16[%c0_75, %c0_76, %c0_77], %187 {strides = array<i32>} : memref<1x16x128xf32, #tpu.memory_space<vmem>>, vector<1x16x128xf32>,
    } else {
    }
    %c0 = arith.constant 0 : index
    %c0_1 = arith.constant 0 : index
    %c0_2 = arith.constant 0 : index
    %3 = vector.load %arg16[%c0, %c0_1, %c0_2] : memref<1x16x128xf32, #tpu.memory_space<vmem>>, vector<1x16x128xf32>
    %4 = vector.shape_cast %3 : vector<1x16x128xf32> to vector<16x128xf32>
    %c0_3 = arith.constant 0 : index
    %c0_4 = arith.constant 0 : index
    %c0_5 = arith.constant 0 : index
    %5 = vector.load %arg3[%c0_3, %c0_4, %c0_5] : memref<1x1x128xf32, #tpu.memory_space<vmem>>, vector<1x1x128xf32>
    %6 = vector.shape_cast %5 : vector<1x1x128xf32> to vector<1x128xf32>
    %c0_6 = arith.constant 0 : index
    %c0_7 = arith.constant 0 : index
    %c0_8 = arith.constant 0 : index
    %7 = vector.load %arg4[%c0_6, %c0_7, %c0_8] : memref<1x1x128xf32, #tpu.memory_space<vmem>>, vector<1x1x128xf32>
    %8 = vector.shape_cast %7 : vector<1x1x128xf32> to vector<1x128xf32>
    %cst = arith.constant dense<0.000000e+00> : vector<16xf32>
    %9 = vector.multi_reduction <add>, %4, %cst [1] : vector<16x128xf32> to vector<16xf32>
    %10 = vector.shape_cast %9 : vector<16xf32> to vector<16x1xf32>
    %cst_9 = arith.constant 1.280000e+02 : f32
    %11 = vector.broadcast %cst_9 : f32 to vector<16x1xf32>
    %12 = arith.divf %10, %11 : vector<16x1xf32>
    %13 = vector.broadcast %12 : vector<16x1xf32> to vector<16x128xf32>
    %14 = arith.subf %4, %13 : vector<16x128xf32>
    %15 = arith.mulf %14, %14 : vector<16x128xf32>
    %cst_10 = arith.constant dense<0.000000e+00> : vector<16xf32>
    %16 = vector.multi_reduction <add>, %15, %cst_10 [1] : vector<16x128xf32> to vector<16xf32>
    %17 = vector.shape_cast %16 : vector<16xf32> to vector<16x1xf32>
    %cst_11 = arith.constant 1.280000e+02 : f32
    %18 = vector.broadcast %cst_11 : f32 to vector<16x1xf32>
    %19 = arith.divf %17, %18 : vector<16x1xf32>
    %20 = vector.broadcast %12 : vector<16x1xf32> to vector<16x128xf32>
    %21 = arith.subf %4, %20 : vector<16x128xf32>
    %cst_12 = arith.constant 9.99999974E-6 : f32
    %22 = vector.broadcast %cst_12 : f32 to vector<16x1xf32>
    %23 = arith.addf %19, %22 : vector<16x1xf32>
    %24 = math.rsqrt %23 : vector<16x1xf32>
    %25 = vector.broadcast %24 : vector<16x1xf32> to vector<16x128xf32>
    %26 = arith.mulf %21, %25 : vector<16x128xf32>
    %27 = vector.broadcast %6 : vector<1x128xf32> to vector<16x128xf32>
    %28 = arith.mulf %26, %27 : vector<16x128xf32>
    %29 = vector.broadcast %8 : vector<1x128xf32> to vector<16x128xf32>
    %30 = arith.addf %28, %29 : vector<16x128xf32>
    %31 = arith.truncf %30 : vector<16x128xf32> to vector<16x128xbf16>
    %c0_13 = arith.constant 0 : index
    %c0_14 = arith.constant 0 : index
    %c0_15 = arith.constant 0 : index
    %32 = vector.load %arg5[%c0_13, %c0_14, %c0_15] : memref<1x128x384xbf16, #tpu.memory_space<vmem>>, vector<1x128x384xbf16>
    %33 = vector.shape_cast %32 : vector<1x128x384xbf16> to vector<128x384xbf16>
    %cst_16 = arith.constant dense<0.000000e+00> : vector<16x384xf32>
    %34 = tpu.matmul %31, %33, %cst_16 {dimension_numbers = #tpu.dot_dimension_numbers<[1], [0], [0], [1], [0, 0, 1, 1], [], []>} : vector<16x128xbf16>, vector<128x384xbf16>, vector<16x384xf32> -> vector<16x384xf32>
    %35 = vector.extract_strided_slice %34 {offsets = [0, 0], sizes = [16, 32], strides = [1, 1]} : vector<16x384xf32> to vector<16x32xf32>
    %36 = arith.truncf %35 : vector<16x32xf32> to vector<16x32xbf16>
    %37 = vector.extract_strided_slice %34 {offsets = [0, 128], sizes = [16, 32], strides = [1, 1]} : vector<16x384xf32> to vector<16x32xf32>
    %38 = arith.truncf %37 : vector<16x32xf32> to vector<16x32xbf16>
    %39 = vector.extract_strided_slice %34 {offsets = [0, 256], sizes = [16, 32], strides = [1, 1]} : vector<16x384xf32> to vector<16x32xf32>
    %40 = arith.truncf %39 : vector<16x32xf32> to vector<16x32xbf16>
    %cst_17 = arith.constant dense<0.000000e+00> : vector<16x16xf32>
    %41 = tpu.matmul %36, %38, %cst_17 {dimension_numbers = #tpu.dot_dimension_numbers<[1], [1], [0], [0], [0, 0, 1, 0], [], []>} : vector<16x32xbf16>, vector<16x32xbf16>, vector<16x16xf32> -> vector<16x16xf32>
    %cst_18 = arith.constant dense<0xFF800000> : vector<16xf32>
    %42 = vector.multi_reduction <maximumf>, %41, %cst_18 [1] : vector<16x16xf32> to vector<16xf32>
    %43 = vector.shape_cast %42 : vector<16xf32> to vector<16x1xf32>
    %44 = vector.broadcast %43 : vector<16x1xf32> to vector<16x16xf32>
    %45 = arith.subf %41, %44 : vector<16x16xf32>
    %46 = math.exp %45 : vector<16x16xf32>
    %cst_19 = arith.constant dense<0.000000e+00> : vector<16xf32>
    %47 = vector.multi_reduction <add>, %46, %cst_19 [1] : vector<16x16xf32> to vector<16xf32>
    %48 = vector.shape_cast %47 : vector<16xf32> to vector<16x1xf32>
    %49 = tpu.reciprocal %48 {approx = true} : vector<16x1xf32> -> vector<16x1xf32>
    %50 = vector.broadcast %49 : vector<16x1xf32> to vector<16x16xf32>
    %51 = arith.mulf %46, %50 : vector<16x16xf32>
    %52 = arith.truncf %51 : vector<16x16xf32> to vector<16x16xbf16>
    %cst_20 = arith.constant dense<0.000000e+00> : vector<16x32xf32>
    %53 = tpu.matmul %52, %40, %cst_20 {dimension_numbers = #tpu.dot_dimension_numbers<[1], [0], [0], [1], [0, 0, 1, 1], [], []>} : vector<16x16xbf16>, vector<16x32xbf16>, vector<16x32xf32> -> vector<16x32xf32>
    %54 = vector.extract_strided_slice %34 {offsets = [0, 32], sizes = [16, 32], strides = [1, 1]} : vector<16x384xf32> to vector<16x32xf32>
    %55 = arith.truncf %54 : vector<16x32xf32> to vector<16x32xbf16>
    %56 = vector.extract_strided_slice %34 {offsets = [0, 160], sizes = [16, 32], strides = [1, 1]} : vector<16x384xf32> to vector<16x32xf32>
    %57 = arith.truncf %56 : vector<16x32xf32> to vector<16x32xbf16>
    %58 = vector.extract_strided_slice %34 {offsets = [0, 288], sizes = [16, 32], strides = [1, 1]} : vector<16x384xf32> to vector<16x32xf32>
    %59 = arith.truncf %58 : vector<16x32xf32> to vector<16x32xbf16>
    %cst_21 = arith.constant dense<0.000000e+00> : vector<16x16xf32>
    %60 = tpu.matmul %55, %57, %cst_21 {dimension_numbers = #tpu.dot_dimension_numbers<[1], [1], [0], [0], [0, 0, 1, 0], [], []>} : vector<16x32xbf16>, vector<16x32xbf16>, vector<16x16xf32> -> vector<16x16xf32>
    %cst_22 = arith.constant dense<0xFF800000> : vector<16xf32>
    %61 = vector.multi_reduction <maximumf>, %60, %cst_22 [1] : vector<16x16xf32> to vector<16xf32>
    %62 = vector.shape_cast %61 : vector<16xf32> to vector<16x1xf32>
    %63 = vector.broadcast %62 : vector<16x1xf32> to vector<16x16xf32>
    %64 = arith.subf %60, %63 : vector<16x16xf32>
    %65 = math.exp %64 : vector<16x16xf32>
    %cst_23 = arith.constant dense<0.000000e+00> : vector<16xf32>
    %66 = vector.multi_reduction <add>, %65, %cst_23 [1] : vector<16x16xf32> to vector<16xf32>
    %67 = vector.shape_cast %66 : vector<16xf32> to vector<16x1xf32>
    %68 = tpu.reciprocal %67 {approx = true} : vector<16x1xf32> -> vector<16x1xf32>
    %69 = vector.broadcast %68 : vector<16x1xf32> to vector<16x16xf32>
    %70 = arith.mulf %65, %69 : vector<16x16xf32>
    %71 = arith.truncf %70 : vector<16x16xf32> to vector<16x16xbf16>
    %cst_24 = arith.constant dense<0.000000e+00> : vector<16x32xf32>
    %72 = tpu.matmul %71, %59, %cst_24 {dimension_numbers = #tpu.dot_dimension_numbers<[1], [0], [0], [1], [0, 0, 1, 1], [], []>} : vector<16x16xbf16>, vector<16x32xbf16>, vector<16x32xf32> -> vector<16x32xf32>
    %73 = vector.extract_strided_slice %34 {offsets = [0, 64], sizes = [16, 32], strides = [1, 1]} : vector<16x384xf32> to vector<16x32xf32>
    %74 = arith.truncf %73 : vector<16x32xf32> to vector<16x32xbf16>
    %75 = vector.extract_strided_slice %34 {offsets = [0, 192], sizes = [16, 32], strides = [1, 1]} : vector<16x384xf32> to vector<16x32xf32>
    %76 = arith.truncf %75 : vector<16x32xf32> to vector<16x32xbf16>
    %77 = vector.extract_strided_slice %34 {offsets = [0, 320], sizes = [16, 32], strides = [1, 1]} : vector<16x384xf32> to vector<16x32xf32>
    %78 = arith.truncf %77 : vector<16x32xf32> to vector<16x32xbf16>
    %cst_25 = arith.constant dense<0.000000e+00> : vector<16x16xf32>
    %79 = tpu.matmul %74, %76, %cst_25 {dimension_numbers = #tpu.dot_dimension_numbers<[1], [1], [0], [0], [0, 0, 1, 0], [], []>} : vector<16x32xbf16>, vector<16x32xbf16>, vector<16x16xf32> -> vector<16x16xf32>
    %cst_26 = arith.constant dense<0xFF800000> : vector<16xf32>
    %80 = vector.multi_reduction <maximumf>, %79, %cst_26 [1] : vector<16x16xf32> to vector<16xf32>
    %81 = vector.shape_cast %80 : vector<16xf32> to vector<16x1xf32>
    %82 = vector.broadcast %81 : vector<16x1xf32> to vector<16x16xf32>
    %83 = arith.subf %79, %82 : vector<16x16xf32>
    %84 = math.exp %83 : vector<16x16xf32>
    %cst_27 = arith.constant dense<0.000000e+00> : vector<16xf32>
    %85 = vector.multi_reduction <add>, %84, %cst_27 [1] : vector<16x16xf32> to vector<16xf32>
    %86 = vector.shape_cast %85 : vector<16xf32> to vector<16x1xf32>
    %87 = tpu.reciprocal %86 {approx = true} : vector<16x1xf32> -> vector<16x1xf32>
    %88 = vector.broadcast %87 : vector<16x1xf32> to vector<16x16xf32>
    %89 = arith.mulf %84, %88 : vector<16x16xf32>
    %90 = arith.truncf %89 : vector<16x16xf32> to vector<16x16xbf16>
    %cst_28 = arith.constant dense<0.000000e+00> : vector<16x32xf32>
    %91 = tpu.matmul %90, %78, %cst_28 {dimension_numbers = #tpu.dot_dimension_numbers<[1], [0], [0], [1], [0, 0, 1, 1], [], []>} : vector<16x16xbf16>, vector<16x32xbf16>, vector<16x32xf32> -> vector<16x32xf32>
    %92 = vector.extract_strided_slice %34 {offsets = [0, 96], sizes = [16, 32], strides = [1, 1]} : vector<16x384xf32> to vector<16x32xf32>
    %93 = arith.truncf %92 : vector<16x32xf32> to vector<16x32xbf16>
    %94 = vector.extract_strided_slice %34 {offsets = [0, 224], sizes = [16, 32], strides = [1, 1]} : vector<16x384xf32> to vector<16x32xf32>
    %95 = arith.truncf %94 : vector<16x32xf32> to vector<16x32xbf16>
    %96 = vector.extract_strided_slice %34 {offsets = [0, 352], sizes = [16, 32], strides = [1, 1]} : vector<16x384xf32> to vector<16x32xf32>
    %97 = arith.truncf %96 : vector<16x32xf32> to vector<16x32xbf16>
    %cst_29 = arith.constant dense<0.000000e+00> : vector<16x16xf32>
    %98 = tpu.matmul %93, %95, %cst_29 {dimension_numbers = #tpu.dot_dimension_numbers<[1], [1], [0], [0], [0, 0, 1, 0], [], []>} : vector<16x32xbf16>, vector<16x32xbf16>, vector<16x16xf32> -> vector<16x16xf32>
    %cst_30 = arith.constant dense<0xFF800000> : vector<16xf32>
    %99 = vector.multi_reduction <maximumf>, %98, %cst_30 [1] : vector<16x16xf32> to vector<16xf32>
    %100 = vector.shape_cast %99 : vector<16xf32> to vector<16x1xf32>
    %101 = vector.broadcast %100 : vector<16x1xf32> to vector<16x16xf32>
    %102 = arith.subf %98, %101 : vector<16x16xf32>
    %103 = math.exp %102 : vector<16x16xf32>
    %cst_31 = arith.constant dense<0.000000e+00> : vector<16xf32>
    %104 = vector.multi_reduction <add>, %103, %cst_31 [1] : vector<16x16xf32> to vector<16xf32>
    %105 = vector.shape_cast %104 : vector<16xf32> to vector<16x1xf32>
    %106 = tpu.reciprocal %105 {approx = true} : vector<16x1xf32> -> vector<16x1xf32>
    %107 = vector.broadcast %106 : vector<16x1xf32> to vector<16x16xf32>
    %108 = arith.mulf %103, %107 : vector<16x16xf32>
    %109 = arith.truncf %108 : vector<16x16xf32> to vector<16x16xbf16>
    %cst_32 = arith.constant dense<0.000000e+00> : vector<16x32xf32>
    %110 = tpu.matmul %109, %97, %cst_32 {dimension_numbers = #tpu.dot_dimension_numbers<[1], [0], [0], [1], [0, 0, 1, 1], [], []>} : vector<16x16xbf16>, vector<16x32xbf16>, vector<16x32xf32> -> vector<16x32xf32>
    %111 = tpu.concatenate %53, %72, %91, %110 in 1 : vector<16x32xf32>, vector<16x32xf32>, vector<16x32xf32>, vector<16x32xf32> -> vector<16x128xf32>
    %112 = arith.truncf %111 : vector<16x128xf32> to vector<16x128xbf16>
    %c0_33 = arith.constant 0 : index
    %c0_34 = arith.constant 0 : index
    %c0_35 = arith.constant 0 : index
    %113 = vector.load %arg6[%c0_33, %c0_34, %c0_35] : memref<1x128x128xbf16, #tpu.memory_space<vmem>>, vector<1x128x128xbf16>
    %114 = vector.shape_cast %113 : vector<1x128x128xbf16> to vector<128x128xbf16>
    %cst_36 = arith.constant dense<0.000000e+00> : vector<16x128xf32>
    %115 = tpu.matmul %112, %114, %cst_36 {dimension_numbers = #tpu.dot_dimension_numbers<[1], [0], [0], [1], [0, 0, 1, 1], [], []>} : vector<16x128xbf16>, vector<128x128xbf16>, vector<16x128xf32> -> vector<16x128xf32>
    %c0_37 = arith.constant 0 : index
    %c0_38 = arith.constant 0 : index
    %c0_39 = arith.constant 0 : index
    %116 = vector.load %arg7[%c0_37, %c0_38, %c0_39] : memref<1x1x128xf32, #tpu.memory_space<vmem>>, vector<1x1x128xf32>
    %117 = vector.shape_cast %116 : vector<1x1x128xf32> to vector<1x128xf32>
    %118 = vector.broadcast %117 : vector<1x128xf32> to vector<16x128xf32>
    %119 = arith.addf %115, %118 : vector<16x128xf32>
    %120 = arith.addf %4, %119 : vector<16x128xf32>
    %c0_40 = arith.constant 0 : index
    %c0_41 = arith.constant 0 : index
    %c0_42 = arith.constant 0 : index
    %121 = vector.load %arg8[%c0_40, %c0_41, %c0_42] : memref<1x1x128xf32, #tpu.memory_space<vmem>>, vector<1x1x128xf32>
    %122 = vector.shape_cast %121 : vector<1x1x128xf32> to vector<1x128xf32>
    %c0_43 = arith.constant 0 : index
    %c0_44 = arith.constant 0 : index
    %c0_45 = arith.constant 0 : index
    %123 = vector.load %arg9[%c0_43, %c0_44, %c0_45] : memref<1x1x128xf32, #tpu.memory_space<vmem>>, vector<1x1x128xf32>
    %124 = vector.shape_cast %123 : vector<1x1x128xf32> to vector<1x128xf32>
    %cst_46 = arith.constant dense<0.000000e+00> : vector<16xf32>
    %125 = vector.multi_reduction <add>, %120, %cst_46 [1] : vector<16x128xf32> to vector<16xf32>
    %126 = vector.shape_cast %125 : vector<16xf32> to vector<16x1xf32>
    %cst_47 = arith.constant 1.280000e+02 : f32
    %127 = vector.broadcast %cst_47 : f32 to vector<16x1xf32>
    %128 = arith.divf %126, %127 : vector<16x1xf32>
    %129 = vector.broadcast %128 : vector<16x1xf32> to vector<16x128xf32>
    %130 = arith.subf %120, %129 : vector<16x128xf32>
    %131 = arith.mulf %130, %130 : vector<16x128xf32>
    %cst_48 = arith.constant dense<0.000000e+00> : vector<16xf32>
    %132 = vector.multi_reduction <add>, %131, %cst_48 [1] : vector<16x128xf32> to vector<16xf32>
    %133 = vector.shape_cast %132 : vector<16xf32> to vector<16x1xf32>
    %cst_49 = arith.constant 1.280000e+02 : f32
    %134 = vector.broadcast %cst_49 : f32 to vector<16x1xf32>
    %135 = arith.divf %133, %134 : vector<16x1xf32>
    %136 = vector.broadcast %128 : vector<16x1xf32> to vector<16x128xf32>
    %137 = arith.subf %120, %136 : vector<16x128xf32>
    %cst_50 = arith.constant 9.99999974E-6 : f32
    %138 = vector.broadcast %cst_50 : f32 to vector<16x1xf32>
    %139 = arith.addf %135, %138 : vector<16x1xf32>
    %140 = math.rsqrt %139 : vector<16x1xf32>
    %141 = vector.broadcast %140 : vector<16x1xf32> to vector<16x128xf32>
    %142 = arith.mulf %137, %141 : vector<16x128xf32>
    %143 = vector.broadcast %122 : vector<1x128xf32> to vector<16x128xf32>
    %144 = arith.mulf %142, %143 : vector<16x128xf32>
    %145 = vector.broadcast %124 : vector<1x128xf32> to vector<16x128xf32>
    %146 = arith.addf %144, %145 : vector<16x128xf32>
    %147 = arith.truncf %146 : vector<16x128xf32> to vector<16x128xbf16>
    %c0_51 = arith.constant 0 : index
    %c0_52 = arith.constant 0 : index
    %c0_53 = arith.constant 0 : index
    %148 = vector.load %arg10[%c0_51, %c0_52, %c0_53] : memref<1x128x384xbf16, #tpu.memory_space<vmem>>, vector<1x128x384xbf16>
    %149 = vector.shape_cast %148 : vector<1x128x384xbf16> to vector<128x384xbf16>
    %cst_54 = arith.constant dense<0.000000e+00> : vector<16x384xf32>
    %150 = tpu.matmul %147, %149, %cst_54 {dimension_numbers = #tpu.dot_dimension_numbers<[1], [0], [0], [1], [0, 0, 1, 1], [], []>} : vector<16x128xbf16>, vector<128x384xbf16>, vector<16x384xf32> -> vector<16x384xf32>
    %c0_55 = arith.constant 0 : index
    %c0_56 = arith.constant 0 : index
    %c0_57 = arith.constant 0 : index
    %151 = vector.load %arg11[%c0_55, %c0_56, %c0_57] : memref<1x1x384xf32, #tpu.memory_space<vmem>>, vector<1x1x384xf32>
    %152 = vector.shape_cast %151 : vector<1x1x384xf32> to vector<1x384xf32>
    %153 = vector.broadcast %152 : vector<1x384xf32> to vector<16x384xf32>
    %154 = arith.addf %150, %153 : vector<16x384xf32>
    %cst_58 = arith.constant 5.000000e-01 : f32
    %155 = vector.broadcast %cst_58 : f32 to vector<16x384xf32>
    %156 = arith.mulf %155, %154 : vector<16x384xf32>
    %cst_59 = arith.constant 4.471500e-02 : f32
    %157 = vector.broadcast %cst_59 : f32 to vector<16x384xf32>
    %158 = arith.mulf %157, %154 : vector<16x384xf32>
    %159 = arith.mulf %158, %154 : vector<16x384xf32>
    %160 = arith.mulf %159, %154 : vector<16x384xf32>
    %161 = arith.addf %154, %160 : vector<16x384xf32>
    %cst_60 = arith.constant 0.797884583 : f32
    %162 = vector.broadcast %cst_60 : f32 to vector<16x384xf32>
    %163 = arith.mulf %162, %161 : vector<16x384xf32>
    %164 = math.tanh %163 : vector<16x384xf32>
    %cst_61 = arith.constant 1.000000e+00 : f32
    %165 = vector.broadcast %cst_61 : f32 to vector<16x384xf32>
    %166 = arith.addf %165, %164 : vector<16x384xf32>
    %167 = arith.mulf %156, %166 : vector<16x384xf32>
    %168 = arith.truncf %167 : vector<16x384xf32> to vector<16x384xbf16>
    %c0_62 = arith.constant 0 : index
    %c0_63 = arith.constant 0 : index
    %c0_64 = arith.constant 0 : index
    %169 = vector.load %arg12[%c0_62, %c0_63, %c0_64] : memref<1x384x128xbf16, #tpu.memory_space<vmem>>, vector<1x384x128xbf16>
    %170 = vector.shape_cast %169 : vector<1x384x128xbf16> to vector<384x128xbf16>
    %cst_65 = arith.constant dense<0.000000e+00> : vector<16x128xf32>
    %171 = tpu.matmul %168, %170, %cst_65 {dimension_numbers = #tpu.dot_dimension_numbers<[1], [0], [0], [1], [0, 0, 1, 1], [], []>} : vector<16x384xbf16>, vector<384x128xbf16>, vector<16x128xf32> -> vector<16x128xf32>
    %c0_66 = arith.constant 0 : index
    %c0_67 = arith.constant 0 : index
    %c0_68 = arith.constant 0 : index
    %172 = vector.load %arg13[%c0_66, %c0_67, %c0_68] : memref<1x1x128xf32, #tpu.memory_space<vmem>>, vector<1x1x128xf32>
    %173 = vector.shape_cast %172 : vector<1x1x128xf32> to vector<1x128xf32>
    %174 = vector.broadcast %173 : vector<1x128xf32> to vector<16x128xf32>
    %175 = arith.addf %171, %174 : vector<16x128xf32>
    %176 = arith.addf %120, %175 : vector<16x128xf32>
    %c1_i32 = arith.constant 1 : i32
    %177 = arith.cmpi ne, %arg1, %c1_i32 : i32
    %178 = arith.extui %177 : i1 to i32
    %c0_i32_69 = arith.constant 0 : i32
    %179 = arith.cmpi ne, %178, %c0_i32_69 : i32
    scf.if %179 {
      %c0_72 = arith.constant 0 : index
      %c0_73 = arith.constant 0 : index
      %c0_74 = arith.constant 0 : index
      %183 = vector.load %arg16[%c0_72, %c0_73, %c0_74] : memref<1x16x128xf32, #tpu.memory_space<vmem>>, vector<1x16x128xf32>
      %184 = vector.shape_cast %183 : vector<1x16x128xf32> to vector<16x128xf32>
      %185 = vector.shape_cast %176 : vector<16x128xf32> to vector<1x16x128xf32>
      tpu.vector_store %arg16[%c0_72, %c0_73, %c0_74], %185 {strides = array<i32>} : memref<1x16x128xf32, #tpu.memory_space<vmem>>, vector<1x16x128xf32>,
    } else {
    }
    %c1_i32_70 = arith.constant 1 : i32
    %180 = arith.cmpi eq, %arg1, %c1_i32_70 : i32
    %181 = arith.extui %180 : i1 to i32
    %c0_i32_71 = arith.constant 0 : i32
    %182 = arith.cmpi ne, %181, %c0_i32_71 : i32
    scf.if %182 {
      %c0_72 = arith.constant 0 : index
      %c0_73 = arith.constant 0 : index
      %183 = vector.load %arg14[%c0_72, %c0_73] : memref<1x128xf32, #tpu.memory_space<vmem>>, vector<1x128xf32>
      %c0_74 = arith.constant 0 : index
      %c0_75 = arith.constant 0 : index
      %184 = vector.load %arg15[%c0_74, %c0_75] : memref<1x128xf32, #tpu.memory_space<vmem>>, vector<1x128xf32>
      %cst_76 = arith.constant dense<0.000000e+00> : vector<16xf32>
      %185 = vector.multi_reduction <add>, %176, %cst_76 [1] : vector<16x128xf32> to vector<16xf32>
      %186 = vector.shape_cast %185 : vector<16xf32> to vector<16x1xf32>
      %cst_77 = arith.constant 1.280000e+02 : f32
      %187 = vector.broadcast %cst_77 : f32 to vector<16x1xf32>
      %188 = arith.divf %186, %187 : vector<16x1xf32>
      %189 = vector.broadcast %188 : vector<16x1xf32> to vector<16x128xf32>
      %190 = arith.subf %176, %189 : vector<16x128xf32>
      %191 = arith.mulf %190, %190 : vector<16x128xf32>
      %cst_78 = arith.constant dense<0.000000e+00> : vector<16xf32>
      %192 = vector.multi_reduction <add>, %191, %cst_78 [1] : vector<16x128xf32> to vector<16xf32>
      %193 = vector.shape_cast %192 : vector<16xf32> to vector<16x1xf32>
      %cst_79 = arith.constant 1.280000e+02 : f32
      %194 = vector.broadcast %cst_79 : f32 to vector<16x1xf32>
      %195 = arith.divf %193, %194 : vector<16x1xf32>
      %196 = vector.broadcast %188 : vector<16x1xf32> to vector<16x128xf32>
      %197 = arith.subf %176, %196 : vector<16x128xf32>
      %cst_80 = arith.constant 9.99999974E-6 : f32
      %198 = vector.broadcast %cst_80 : f32 to vector<16x1xf32>
      %199 = arith.addf %195, %198 : vector<16x1xf32>
      %200 = math.rsqrt %199 : vector<16x1xf32>
      %201 = vector.broadcast %200 : vector<16x1xf32> to vector<16x128xf32>
      %202 = arith.mulf %197, %201 : vector<16x128xf32>
      %203 = vector.broadcast %183 : vector<1x128xf32> to vector<16x128xf32>
      %204 = arith.mulf %202, %203 : vector<16x128xf32>
      %205 = vector.broadcast %184 : vector<1x128xf32> to vector<16x128xf32>
      %206 = arith.addf %204, %205 : vector<16x128xf32>
      %c0_81 = arith.constant 0 : index
      %c0_82 = arith.constant 0 : index
      %c0_83 = arith.constant 0 : index
      %207 = vector.load %arg16[%c0_81, %c0_82, %c0_83] : memref<1x16x128xf32, #tpu.memory_space<vmem>>, vector<1x16x128xf32>
      %208 = vector.shape_cast %207 : vector<1x16x128xf32> to vector<16x128xf32>
      %209 = vector.shape_cast %206 : vector<16x128xf32> to vector<1x16x128xf32>
      tpu.vector_store %arg16[%c0_81, %c0_82, %c0_83], %209 {strides = array<i32>} : memref<1x16x128xf32, #tpu.memory_space<vmem>>, vector<1x16x128xf32>,
    } else {
    }
    return
  }
  func.func @transform_0(%arg0: i32, %arg1: i32) -> (i32, i32, i32) {
    %c0_i32 = arith.constant 0 : i32
    %c0_i32_0 = arith.constant 0 : i32
    %c0_i32_1 = arith.constant 0 : i32
    return %arg0, %c0_i32, %c0_i32_0 : i32, i32, i32
  }
  func.func @transform_1(%arg0: i32, %arg1: i32) -> (i32, i32, i32) {
    %c0_i32 = arith.constant 0 : i32
    %c0_i32_0 = arith.constant 0 : i32
    %c0_i32_1 = arith.constant 0 : i32
    return %arg1, %c0_i32, %c0_i32_0 : i32, i32, i32
  }
  func.func @transform_2(%arg0: i32, %arg1: i32) -> (i32, i32, i32) {
    %c0_i32 = arith.constant 0 : i32
    %c0_i32_0 = arith.constant 0 : i32
    %c0_i32_1 = arith.constant 0 : i32
    return %arg1, %c0_i32, %c0_i32_0 : i32, i32, i32
  }
  func.func @transform_3(%arg0: i32, %arg1: i32) -> (i32, i32, i32) {
    %c0_i32 = arith.constant 0 : i32
    %c0_i32_0 = arith.constant 0 : i32
    %c0_i32_1 = arith.constant 0 : i32
    return %arg1, %c0_i32, %c0_i32_0 : i32, i32, i32
  }
  func.func @transform_4(%arg0: i32, %arg1: i32) -> (i32, i32, i32) {
    %c0_i32 = arith.constant 0 : i32
    %c0_i32_0 = arith.constant 0 : i32
    %c0_i32_1 = arith.constant 0 : i32
    return %arg1, %c0_i32, %c0_i32_0 : i32, i32, i32
  }
  func.func @transform_5(%arg0: i32, %arg1: i32) -> (i32, i32, i32) {
    %c0_i32 = arith.constant 0 : i32
    %c0_i32_0 = arith.constant 0 : i32
    %c0_i32_1 = arith.constant 0 : i32
    return %arg1, %c0_i32, %c0_i32_0 : i32, i32, i32
  }
  func.func @transform_6(%arg0: i32, %arg1: i32) -> (i32, i32, i32) {
    %c0_i32 = arith.constant 0 : i32
    %c0_i32_0 = arith.constant 0 : i32
    %c0_i32_1 = arith.constant 0 : i32
    return %arg1, %c0_i32, %c0_i32_0 : i32, i32, i32
  }
  func.func @transform_7(%arg0: i32, %arg1: i32) -> (i32, i32, i32) {
    %c0_i32 = arith.constant 0 : i32
    %c0_i32_0 = arith.constant 0 : i32
    %c0_i32_1 = arith.constant 0 : i32
    return %arg1, %c0_i32, %c0_i32_0 : i32, i32, i32
  }
  func.func @transform_8(%arg0: i32, %arg1: i32) -> (i32, i32, i32) {
    %c0_i32 = arith.constant 0 : i32
    %c0_i32_0 = arith.constant 0 : i32
    %c0_i32_1 = arith.constant 0 : i32
    return %arg1, %c0_i32, %c0_i32_0 : i32, i32, i32
  }
  func.func @transform_9(%arg0: i32, %arg1: i32) -> (i32, i32, i32) {
    %c0_i32 = arith.constant 0 : i32
    %c0_i32_0 = arith.constant 0 : i32
    %c0_i32_1 = arith.constant 0 : i32
    return %arg1, %c0_i32, %c0_i32_0 : i32, i32, i32
  }
  func.func @transform_10(%arg0: i32, %arg1: i32) -> (i32, i32, i32) {
    %c0_i32 = arith.constant 0 : i32
    %c0_i32_0 = arith.constant 0 : i32
    %c0_i32_1 = arith.constant 0 : i32
    return %arg1, %c0_i32, %c0_i32_0 : i32, i32, i32
  }
  func.func @transform_11(%arg0: i32, %arg1: i32) -> (i32, i32, i32) {
    %c0_i32 = arith.constant 0 : i32
    %c0_i32_0 = arith.constant 0 : i32
    %c0_i32_1 = arith.constant 0 : i32
    return %arg1, %c0_i32, %c0_i32_0 : i32, i32, i32
  }
  func.func @transform_12(%arg0: i32, %arg1: i32) -> (i32, i32) {
    %c0_i32 = arith.constant 0 : i32
    %c0_i32_0 = arith.constant 0 : i32
    %c0_i32_1 = arith.constant 0 : i32
    return %c0_i32, %c0_i32_0 : i32, i32
  }
  func.func @transform_13(%arg0: i32, %arg1: i32) -> (i32, i32) {
    %c0_i32 = arith.constant 0 : i32
    %c0_i32_0 = arith.constant 0 : i32
    %c0_i32_1 = arith.constant 0 : i32
    return %c0_i32, %c0_i32_0 : i32, i32
  }
  func.func @transform_14(%arg0: i32, %arg1: i32) -> (i32, i32, i32) {
    %c0_i32 = arith.constant 0 : i32
    %c0_i32_0 = arith.constant 0 : i32
    %c0_i32_1 = arith.constant 0 : i32
    return %arg0, %c0_i32, %c0_i32_0 : i32, i32, i32
  }
}

</mosaic_0001>

<bundles_post_ra>
// kernel: transformer_forward_pallas.1
= control target key start
LH: loop header
LB: loop body
LE: loop exit
PB: predicated region body
PF: predicated region fallthrough
CT: control target
= control target key end

     0   :  { %s4592_s0 = inlined_call_operand.hbm [shape: f32[2,16,128], index: 0, kind: input, shape index: {}]   ;;  %s4593_s1 = inlined_call_operand.vmem [shape: f32[2,1,128], index: 1, kind: input, shape index: {}]   ;;  %s4594_s2 = inlined_call_operand.hbm [shape: f32[2,1,128], index: 2, kind: input, shape index: {}]   ;;  %s4595_s3 = inlined_call_operand.hbm [shape: bf16[2,128,384], index: 3, kind: input, shape index: {}]   ;;  %s4596_s4 = inlined_call_operand.hbm [shape: bf16[2,128,128], index: 4, kind: input, shape index: {}]   ;;  %s4597_s5 = inlined_call_operand.vmem [shape: f32[2,1,128], index: 5, kind: input, shape index: {}]   ;;  %s4598_s6 = inlined_call_operand.vmem [shape: f32[2,1,128], index: 6, kind: input, shape index: {}]   ;;  %s4599_s7 = inlined_call_operand.hbm [shape: f32[2,1,128], index: 7, kind: input, shape index: {}]   ;;  %s4600_s8 = inlined_call_operand.hbm [shape: bf16[2,128,384], index: 8, kind: input, shape index: {}]   ;;  %s4601_s9 = inlined_call_operand.vmem [shape: f32[2,1,384], index: 9, kind: input, shape index: {}]   ;;  %s4602_s10 = inlined_call_operand.hbm [shape: bf16[2,384,128], index: 10, kind: input, shape index: {}]   ;;  %s4603_s11 = inlined_call_operand.vmem [shape: f32[2,1,128], index: 11, kind: input, shape index: {}]   ;;  %s4604_s12 = inlined_call_operand.vmem [shape: f32[1,128], index: 12, kind: input, shape index: {}]   ;;  %s4605_s13 = inlined_call_operand.vmem [shape: f32[1,128], index: 13, kind: input, shape index: {}]   ;;  %s4606_s14 = inlined_call_operand.hbm [shape: f32[2,16,128], index: 14, kind: output, shape index: {}]  }
   0x1   :  { %4641 = sst [smem:[#allocation36_spill]] %s4592_s0 }
   0x2   :  { %4642 = sst [smem:[#allocation37_spill]] %s4593_s1 }
   0x3   :  { %4643 = sst [smem:[#allocation38_spill]] %s4594_s2 }
   0x4   :  { %4644 = sst [smem:[#allocation39_spill]] %s4595_s3 }
   0x5   :  { %4645 = sst [smem:[#allocation40_spill]] %s4596_s4 }
   0x6   :  { %4646 = sst [smem:[#allocation41_spill]] %s4597_s5 }
   0x7   :  { %4647 = sst [smem:[#allocation42_spill]] %s4598_s6 }
   0x8   :  { %4648 = sst [smem:[#allocation43_spill]] %s4599_s7 }
   0x9   :  { %4649 = sst [smem:[#allocation44_spill]] %s4600_s8 }
   0xa   :  { %4650 = sst [smem:[#allocation45_spill]] %s4601_s9 }
   0xb   :  { %4651 = sst [smem:[#allocation46_spill]] %s4602_s10 }
   0xc   :  { %4652 = sst [smem:[#allocation47_spill]] %s4603_s11 }
   0xd   :  { %4653 = sst [smem:[#allocation48_spill]] %s4604_s12 }
   0xe   :  { %4654 = sst [smem:[#allocation49_spill]] %s4605_s13 }
   0xf   :  { %4655 = sst [smem:[#allocation50_spill]] %s4606_s14 }
  0x10   :  { %19 = vsyncpa [#allocation3], 0 }
  0x11   :  { %21 = vsyncpa [#allocation3 + $0x1], 0 }
  0x12   :  { %22 = vsyncpa [#allocation6], 0 }
  0x13   :  { %24 = vsyncpa [#allocation6 + $0x1], 0 }
  0x14   :  { %25 = vsyncpa [#allocation9], 0 }
  0x15   :  { %27 = vsyncpa [#allocation9 + $0x1], 0 }
  0x16   :  { %28 = vsyncpa [#allocation12], 0 }
  0x17   :  { %30 = vsyncpa [#allocation12 + $0x1], 0 }
  0x18   :  { %31 = vsyncpa [#allocation4], 0 }
  0x19   :  { %33 = vsyncpa [#allocation4 + $0x1], 0  ;;  %s3774_s29 = smov 0   ;;  %s3776_s30 = smov 0  }
  0x1a   :  { %s3778_s15 = smov 0   ;;  %s3780_s16 = smov 0  }
  0x1b   :  { %s3782_s17 = smov 0   ;;  %s3784_s18 = smov 0  }
  0x1c   :  { %s3786_s19 = smov 0   ;;  %s3788_s20 = smov 0  }
  0x1d   :  { %s3790_s21 = smov 0   ;;  %s3792_s22 = smov 0  }
  0x1e   :  { %s3794_s23 = smov 0  }
  0x1f LB: > { %4656 = sst [smem:[#allocation20_spill]] %s3639_s30  ;;  %s3828_s24 = sadd.s32 4294967295, %s3675_s23   ;;  %s3675_s23 = sphi %s3794_s23, %s39_s23   ;;  %s3671_s22 = sphi %s3792_s22, %s4741_s22   ;;  %s3667_s21 = sphi %s3790_s21, %s4740_s21   ;;  %s3663_s20 = sphi %s3788_s20, %s4739_s20   ;;  %s3659_s19 = sphi %s3786_s19, %s4738_s19   ;;  %s3655_s18 = sphi %s3784_s18, %s4737_s18   ;;  %s3651_s17 = sphi %s3782_s17, %s4736_s17   ;;  %s3647_s16 = sphi %s3780_s16, %s4735_s16   ;;  %s3643_s15 = sphi %s3778_s15, %s4734_s15   ;;  %s3639_s30 = sphi %s3776_s30, %s4733_s30   ;;  %s3635_s29 = sphi %s3774_s29, %s4732_s29  }
  0x20   : > { %4657 = sst [smem:[#allocation21_spill]] %s3643_s15  ;;  %s48_s25 = sadd.s32 1, %s3667_s21 }
  0x21   : > { %4658 = sst [smem:[#allocation22_spill]] %s3647_s16  ;;  %p3831_p0 = scmp.ge.s32.totalorder %s48_s25, 2 }
  0x22   : > { %4659 = sst [smem:[#allocation23_spill]] %s3651_s17  ;;  %p4617_p1 = scmp.eq.s32.totalorder %s3675_s23, 0 }
  0x23   : > { %4660 = sst [smem:[#allocation24_spill]] %s3655_s18  ;;  %p4616_p2 = scmp.eq.s32.totalorder %s3828_s24, 0 }
  0x24   : > { %4661 = sst [smem:[#allocation25_spill]] %s3659_s19  ;;  %s110_s27 = sadd.s32 1, %s3643_s15 }
  0x25   : > { %4662 = sst [smem:[#allocation26_spill]] %s3663_s20  ;;  %s4743_s25 = smov (%p3831_p0, %s48_s25), 0 }
  0x26   : > { %4663 = sst [smem:[#allocation27_spill]] %s3667_s21  ;;  %p117_p3 = scmp.ne.s32.totalorder %s3643_s15, %s3639_s30 }
  0x27   : > { %4664 = sst [smem:[#allocation28_spill]] %s3671_s22  ;;  %p123_p4 = scmp.ne.s32.totalorder %s3639_s30, %s3635_s29 }
  0x28   : > { %s4665_s26 = scalar_select %p3831_p0, 1, 0 }
  0x29   : > { %4666 = sst [smem:[#allocation29_spill]] %s4743_s25  ;;  %s107_s28 = ssub.s32 %s3667_s21, %s4743_s25 }
  0x2a   : > { %p108_p5 = scmp.eq.s32.totalorder %s107_s28, 0  ;;  %p119_p6 = por %p117_p3, %p4617_p1 }
  0x2b   : > { %p3851_p7 = por %p123_p4, %p4616_p2  ;;  %p4615_p8 = scmp.lt.s32.totalorder %s3675_s23, 4 }
  0x2c   : > { %s3857_s20 = scalar_select %p108_p5, %s3643_s15, %s110_s27  }
  0x2d   : > { %s4667_s14 = scalar_select %p3851_p7, 1, 0 }
  0x2e   : > { %4669 = sst [smem:[#allocation31_spill]] %s3857_s20  ;;  %s3860_s13 = sand.u32 1, %s3675_s23  }
  0x2f   : > { %4668 = sst [smem:[#allocation30_spill]] %s4667_s14  ;;  %s3863_s12 = sand.u32 1, %s3643_s15  }
  0x30   : > { %s2689_s29 = sshll.u32 %s3667_s21, 4  ;;  %s485_s25 = scalar_lea.vmem [#allocation5], %s3863_s12 }
  0x31   : > { %s492_s28 = sshll.u32 %s485_s25, 4  ;;  %s4670_s2 = sld [smem:[#allocation38_spill]]  ;;  %s3872_s28 = int_to_ptr.vmem [resolvable:$true] %s492_s28 }
  0x32   : > { %p3876_p9 = pnand %p4615_p8, %p119_p6  ;;  %s3881_s20 = smul.u32 192, %s3863_s12 }
  0x33   : > { %s4672_s7 = sld [smem:[#allocation43_spill]]  ;;  %s4620_s11 = scalar_lea.sflag [#allocation6], %s3860_s13 }
  0x34   : > { %s4671_s27 = scalar_select %p3876_p9, 1, 0 }
  0x35   : > { %p3893_p11 = pneg %p3876_p9 }
  0x37   : > { %s3870_s6 = scalar_lea.hbm %s4670_s2, %s2689_s29  ;;  %s3336_s30 = scalar_lea.hbm %s4670_s2, 32 }
  0x38   : > { %s3331_s5 = scalar_lea.hbm %s3870_s6, 16  ;;  %p3337_p3 = scmp.lt.u32.totalorder %s3870_s6, %s4670_s2 }
  0x39   : > { %s3886_s9 = scalar_lea.hbm %s4672_s7, %s2689_s29  ;;  %p3332_p10 = scmp.ne.s32.totalorder %s3870_s6, %s3331_s5 }
  0x3a   : > { %p3338_p4 = scmp.lt.u32.totalorder %s3336_s30, %s3331_s5  ;;  %p3340_p6 = scmp.lt.u32.totalorder %s3331_s5, %s3870_s6 }
  0x3b   : > { %p3334_p12 = pnand %p3893_p11, %p3332_p10 }
  0x3c   : > { %p3339_p5 = por %p3338_p4, %p3337_p3 }
  0x3d   : > { %p3335_p13 = pneg %p3334_p12 }
  0x3e   : > { %p3341_p8 = por %p3340_p6, %p3339_p5 }
  0x40   : > { %p3342_p2 = pnand %p3341_p8, %p3335_p13 }
  0x42   : > { %3345 = shalt.err (!%p3342_p2)
}
  0x43   : > { %s3346_s29 = scalar_lea.vmem %s3872_s28, 16  ;;  %s3677_s14 = smov [#allocation5]  }
  0x44   : > { %p3347_p10 = scmp.ne.s32.totalorder %s3872_s28, %s3346_s29  ;;  %s3351_s19 = sshll.u32 %s3677_s14, 4  ;;  %s3352_s19 = int_to_ptr.vmem [resolvable:$false] %s3351_s19 }
  0x45   : > { %s3353_s10 = scalar_lea.vmem %s3352_s19, 32  ;;  %p3354_p7 = scmp.lt.s32.totalorder %s3872_s28, %s3352_s19 }
  0x46   : > { %p3349_p12 = pnand %p3347_p10, %p3893_p11  ;;  %p3355_p0 = scmp.lt.s32.totalorder %s3353_s10, %s3346_s29 }
  0x48   : > { %p3350_p1 = pneg %p3349_p12  ;;  %p3356_p3 = por %p3355_p0, %p3354_p7 }
  0x4a   : > { %p3357_p4 = pnand %p3356_p3, %p3350_p1 }
  0x4c   : > { %3360 = shalt.err (!%p3357_p4)
}
  0x4d   : > { %3040 = dma.hbm_to_vmem [thread:$0]  (!%p3876_p9), %s3870_s6, 16, %s3872_s28, %s4620_s11  }
  0x4e   : > { %p2697_p2 = scmp.ge.s32.totalorder %s3675_s23, 1  ;;  %p623_p8 = scmp.lt.s32.totalorder %s3675_s23, 5 }
  0x4f   : > { %s2691_s5 = sshll.u32 %s3863_s12, 6  ;;  %s2806_s30 = sshll.u32 %s3667_s21, 10 }
  0x50   : > { %p3922_p0 = pnand %p2697_p2, %p623_p8  ;;  %s4676_s4 = sld [smem:[#allocation40_spill]] }
  0x51   : > { %s524_s19 = scalar_lea.vmem [#allocation8], %s2691_s5  ;;  %s3934_s6 = smul.u32 3072, %s3667_s21 }
  0x52   : > { %s4674_s25 = scalar_select %p3922_p0, 1, 0 }
  0x53   : > { %s531_s10 = sshll.u32 %s524_s19, 4  ;;  %s4625_s28 = scalar_lea.sflag [#allocation9], %s3860_s13  ;;  %s3931_s10 = int_to_ptr.vmem [resolvable:$true] %s531_s10 }
  0x54   : > { %4675 = sst [smem:[#allocation32_spill]] %s4674_s25 }
  0x56   : > { %s3929_s14 = scalar_lea.hbm %s4676_s4, %s2806_s30  ;;  %s3366_s30 = scalar_lea.hbm %s4676_s4, 2048 }
  0x57   : > { %s3361_s11 = scalar_lea.hbm %s3929_s14, 1024  ;;  %p3367_p5 = scmp.lt.u32.totalorder %s3929_s14, %s4676_s4 }
  0x58   : > { %p3362_p1 = scmp.ne.s32.totalorder %s3929_s14, %s3361_s11  ;;  %p3368_p6 = scmp.lt.u32.totalorder %s3366_s30, %s3361_s11 }
  0x59   : > { %p3370_p12 = scmp.lt.u32.totalorder %s3361_s11, %s3929_s14 }
  0x5a   : > { %p3364_p7 = pnand %p3362_p1, %p3893_p11  ;;  %p3369_p10 = por %p3368_p6, %p3367_p5 }
  0x5c   : > { %p3365_p13 = pneg %p3364_p7  ;;  %p3371_p3 = por %p3370_p12, %p3369_p10 }
  0x5e   : > { %p3372_p4 = pnand %p3371_p3, %p3365_p13 }
  0x60   : > { %3375 = shalt.err (!%p3372_p4)
}
  0x61   : > { %s3376_s5 = scalar_lea.vmem %s3931_s10, 1024  ;;  %s3678_s2 = smov [#allocation8]  }
  0x62   : > { %p3377_p2 = scmp.ne.s32.totalorder %s3931_s10, %s3376_s5  ;;  %s3381_s19 = sshll.u32 %s3678_s2, 4  ;;  %s3382_s19 = int_to_ptr.vmem [resolvable:$false] %s3381_s19 }
  0x63   : > { %s3383_s25 = scalar_lea.vmem %s3382_s19, 2048  ;;  %p3384_p7 = scmp.lt.s32.totalorder %s3931_s10, %s3382_s19 }
  0x64   : > { %p3379_p8 = pnand %p3377_p2, %p3893_p11  ;;  %p3385_p0 = scmp.lt.s32.totalorder %s3383_s25, %s3376_s5 }
  0x66   : > { %p3380_p1 = pneg %p3379_p8  ;;  %p3386_p5 = por %p3385_p0, %p3384_p7 }
  0x68   : > { %p3387_p6 = pnand %p3386_p5, %p3380_p1 }
  0x6a   : > { %3390 = shalt.err (!%p3387_p6)
}
  0x6b   : > { %s4622_s11 = smov 64   ;;  %s4624_s15 = smov 4  }
  0x6c   : > { %3046 = dma.hbm_to_vmem [thread:$0]  (!%p3876_p9), %s3929_s14, 1024, %s3931_s10, %s4625_s28, %s4622_s11, %s4622_s11, %s4624_s15  }
  0x6d   : > { %s4677_s8 = sld [smem:[#allocation44_spill]]  ;;  %s574_s2 = scalar_lea.vmem [#allocation11], %s3881_s20 }
  0x6e   : > { %s581_s19 = sshll.u32 %s574_s2, 4  ;;  %s4623_s25 = scalar_lea.sflag [#allocation12], %s3860_s13  ;;  %s3970_s19 = int_to_ptr.vmem [resolvable:$true] %s581_s19 }
  0x73   : > { %s3967_s5 = scalar_lea.hbm %s4677_s8, %s3934_s6  ;;  %s3396_s30 = scalar_lea.hbm %s4677_s8, 6144 }
  0x74   : > { %s3391_s4 = scalar_lea.hbm %s3967_s5, 3072  ;;  %p3397_p12 = scmp.lt.u32.totalorder %s3967_s5, %s4677_s8 }
  0x75   : > { %p3392_p0 = scmp.ne.s32.totalorder %s3967_s5, %s3391_s4  ;;  %p3398_p3 = scmp.lt.u32.totalorder %s3396_s30, %s3391_s4 }
  0x76   : > { %p3400_p2 = scmp.lt.u32.totalorder %s3391_s4, %s3967_s5 }
  0x77   : > { %p3394_p13 = pnand %p3392_p0, %p3893_p11  ;;  %p3399_p4 = por %p3398_p3, %p3397_p12 }
  0x79   : > { %p3395_p10 = pneg %p3394_p13  ;;  %p3401_p8 = por %p3400_p2, %p3399_p4 }
  0x7b   : > { %p3402_p1 = pnand %p3401_p8, %p3395_p10 }
  0x7d   : > { %3405 = shalt.err (!%p3402_p1)
}
  0x7e   : > { %s3406_s2 = scalar_lea.vmem %s3970_s19, 3072  ;;  %s3681_s14 = smov [#allocation11]  }
  0x7f   : > { %p3407_p7 = scmp.ne.s32.totalorder %s3970_s19, %s3406_s2  ;;  %s3411_s10 = sshll.u32 %s3681_s14, 4  ;;  %s3412_s10 = int_to_ptr.vmem [resolvable:$false] %s3411_s10 }
  0x80   : > { %s3413_s11 = scalar_lea.vmem %s3412_s10, 6144  ;;  %p3414_p0 = scmp.lt.s32.totalorder %s3970_s19, %s3412_s10 }
  0x81   : > { %p3409_p5 = pnand %p3407_p7, %p3893_p11  ;;  %p3415_p13 = scmp.lt.s32.totalorder %s3413_s11, %s3406_s2 }
  0x83   : > { %p3410_p6 = pneg %p3409_p5  ;;  %p3416_p12 = por %p3415_p13, %p3414_p0 }
  0x85   : > { %p3417_p3 = pnand %p3416_p12, %p3410_p6 }
  0x87   : > { %3420 = shalt.err (!%p3417_p3)
}
  0x88   : > { %s4626_s4 = smov 192   ;;  %s4627_s30 = smov 12  }
  0x89   : > { %3052 = dma.hbm_to_vmem [thread:$0]  (!%p3876_p9), %s3967_s5, 3072, %s3970_s19, %s4623_s25, %s4626_s4, %s4626_s4, %s4627_s30  }
  0x8a   : > { %s2683_s29 = sadd.s32 4294967294, %s3675_s23   ;;  %s51_s2 = sadd.s32 1, %s3671_s22 }
  0x8b   : > { %p4678_p10 = scmp.ne.s32.totalorder %s4665_s26, 0  ;;  %s58_s14 = sadd.s32 1, %s3655_s18 }
  0x8c   : > { %p65_p4 = scmp.ne.s32.totalorder %s3655_s18, %s3651_s17  ;;  %p71_p8 = scmp.ne.s32.totalorder %s3651_s17, %s3647_s16 }
  0x8d   : > { %s4745_s2 = smov (!%p4678_p10, %s51_s2), %s3671_s22  ;;  %p4679_p1 = scmp.eq.s32.totalorder %s3675_s23, 0 }
  0x8e   : > { %p53_p2 = scmp.ge.s32.totalorder %s4745_s2, 2  ;;  %p423_p5 = scmp.eq.s32.totalorder %s3828_s24, 3 }
  0x8f   : > { %p4011_p7 = por %p4679_p1, %p65_p4  ;;  %p4682_p6 = scmp.eq.s32.totalorder %s3828_s24, 0 }
  0x90   : > { %s4747_s2 = smov (%p53_p2, %s4745_s2), 0  ;;  %p4024_p13 = por %p423_p5, %p65_p4 }
  0x91   : > { %4681 = sst [smem:[#allocation33_spill]] %s4747_s2  ;;  %p4020_p0 = por %p4682_p6, %p71_p8 }
  0x92   : > { %s4684_s5 = scalar_select %p4024_p13, 1, 0 }
  0x93   : > { %s4683_s26 = scalar_select %p4020_p0, 1, 0 }
  0x94   : > { %s55_s19 = ssub.s32 %s3671_s22, %s4747_s2  ;;  %p429_p12 = scmp.eq.s32.totalorder %s2683_s29, 3 }
  0x95   : > { %p56_p3 = scmp.eq.s32.totalorder %s55_s19, 0  ;;  %s455_s11 = sand.u32 1, %s3655_s18  }
  0x96   : > { %p4031_p10 = por %p429_p12, %p71_p8  ;;  %s2686_s28 = sshll.u32 %s455_s11, 4 }
  0x97   : > { %s4036_s15 = scalar_select %p56_p3, %s3655_s18, %s58_s14  }
  0x98   : > { %s4685_s25 = scalar_select %p4031_p10, 1, 0 }
  0x99   : > { %4687 = sst [smem:[#allocation35_spill]] %s4036_s15  ;;  %s2805_s4 = sshll.u32 %s3671_s22, 8 }
  0x9a   : > { %4686 = sst [smem:[#allocation34_spill]] %s4685_s25  ;;  %s4688_s0 = sld [smem:[#allocation36_spill]] }
  0x9b   : > { %s459_s29 = scalar_lea.vmem [#allocation2], %s2686_s28  ;;  %p4689_p4 = scmp.lt.s32.totalorder %s3675_s23, 4 }
  0x9c   : > { %s466_s19 = sshll.u32 %s459_s29, 4  ;;  %s4054_s14 = scalar_lea.sflag [#allocation3], %s455_s11  ;;  %s4052_s19 = int_to_ptr.vmem [resolvable:$true] %s466_s19 }
  0x9d   : > { %p4048_p2 = pnand %p4689_p4, %p4011_p7 }
  0x9f   : > { %p3423_p1 = pneg %p4048_p2 }
  0xa0   : > { %s4042_s21 = scalar_lea.hbm %s4688_s0, %s2805_s4  ;;  %s3426_s30 = scalar_lea.hbm %s4688_s0, 512 }
  0xa1   : > { %s3421_s8 = scalar_lea.hbm %s4042_s21, 256  ;;  %p3427_p7 = scmp.lt.u32.totalorder %s4042_s21, %s4688_s0 }
  0xa2   : > { %p3422_p8 = scmp.ne.s32.totalorder %s4042_s21, %s3421_s8  ;;  %p3428_p12 = scmp.lt.u32.totalorder %s3426_s30, %s3421_s8 }
  0xa3   : > { %p3430_p4 = scmp.lt.u32.totalorder %s3421_s8, %s4042_s21 }
  0xa4   : > { %p3424_p5 = pnand %p3423_p1, %p3422_p8  ;;  %p3429_p3 = por %p3428_p12, %p3427_p7 }
  0xa6   : > { %p3425_p6 = pneg %p3424_p5  ;;  %p3431_p10 = por %p3430_p4, %p3429_p3 }
  0xa8   : > { %p3432_p13 = pnand %p3431_p10, %p3425_p6 }
  0xaa   : > { %3435 = shalt.err (!%p3432_p13)
}
  0xab   : > { %s3436_s11 = scalar_lea.vmem %s4052_s19, 256  ;;  %s3684_s28 = smov [#allocation2]  }
  0xac   : > { %p3437_p8 = scmp.ne.s32.totalorder %s4052_s19, %s3436_s11  ;;  %s3441_s4 = sshll.u32 %s3684_s28, 4  ;;  %s3442_s4 = int_to_ptr.vmem [resolvable:$false] %s3441_s4 }
  0xad   : > { %s3443_s10 = scalar_lea.vmem %s3442_s4, 512  ;;  %p3444_p9 = scmp.lt.s32.totalorder %s4052_s19, %s3442_s4 }
  0xae   : > { %p3439_p5 = pnand %p3437_p8, %p3423_p1  ;;  %p3445_p7 = scmp.lt.s32.totalorder %s3443_s10, %s3436_s11 }
  0xb0   : > { %p3440_p0 = pneg %p3439_p5  ;;  %p3446_p12 = por %p3445_p7, %p3444_p9 }
  0xb2   : > { %p3447_p3 = pnand %p3446_p12, %p3440_p0 }
  0xb4   : > { %3450 = shalt.err (!%p3447_p3)
}
  0xb5   : > { %s3685_s8 = smov 128   ;;  %s3686_s30 = smov 8  }
  0xb6   : > { %3037 = dma.hbm_to_vmem [thread:$0]  (!%p4048_p2), %s4042_s21, 256, %s4052_s19, %s4054_s14, %s3685_s8, %s3685_s8, %s3686_s30  }
  0xb7   : > { %s4691_s3 = sld [smem:[#allocation39_spill]]  ;;  %s503_s11 = scalar_lea.vmem [#allocation7], %s3881_s20 }
  0xb8   : > { %s510_s10 = sshll.u32 %s503_s11, 4  ;;  %s556_s0 = scalar_lea.vmem [#allocation10], %s3863_s12  ;;  %s4089_s10 = int_to_ptr.vmem [resolvable:$true] %s510_s10 }
  0xb9   : > { %s4092_s22 = sshll.u32 %s556_s0, 4  ;;  %s564_s22 = int_to_ptr.vmem [resolvable:$true] %s4092_s22 }
  0xbd   : > { %s4086_s4 = scalar_lea.hbm %s4691_s3, %s3934_s6  ;;  %s3456_s19 = scalar_lea.hbm %s4691_s3, 6144 }
  0xbe   : > { %s3451_s15 = scalar_lea.hbm %s4086_s4, 3072  ;;  %p3457_p10 = scmp.lt.u32.totalorder %s4086_s4, %s4691_s3 }
  0xbf   : > { %p3452_p9 = scmp.ne.s32.totalorder %s4086_s4, %s3451_s15  ;;  %p3458_p2 = scmp.lt.u32.totalorder %s3456_s19, %s3451_s15 }
  0xc0   : > { %p3460_p6 = scmp.lt.u32.totalorder %s3451_s15, %s4086_s4 }
  0xc1   : > { %p3454_p0 = pnand %p3452_p9, %p3893_p11  ;;  %p3459_p1 = por %p3458_p2, %p3457_p10 }
  0xc3   : > { %p3455_p13 = pneg %p3454_p0  ;;  %p3461_p4 = por %p3460_p6, %p3459_p1 }
  0xc5   : > { %p3462_p8 = pnand %p3461_p4, %p3455_p13 }
  0xc7   : > { %3465 = shalt.err (!%p3462_p8)
}
  0xc8   : > { %s3466_s0 = scalar_lea.vmem %s4089_s10, 3072  ;;  %s3687_s12 = smov [#allocation7]  }
  0xc9   : > { %p3467_p5 = scmp.ne.s32.totalorder %s4089_s10, %s3466_s0  ;;  %s3471_s30 = sshll.u32 %s3687_s12, 4  ;;  %s3472_s30 = int_to_ptr.vmem [resolvable:$false] %s3471_s30 }
  0xca   : > { %s3473_s29 = scalar_lea.vmem %s3472_s30, 6144  ;;  %p3474_p3 = scmp.lt.s32.totalorder %s4089_s10, %s3472_s30 }
  0xcb   : > { %p3469_p7 = pnand %p3467_p5, %p3893_p11  ;;  %p3475_p9 = scmp.lt.s32.totalorder %s3473_s29, %s3466_s0 }
  0xcd   : > { %p3470_p12 = pneg %p3469_p7  ;;  %p3476_p0 = por %p3475_p9, %p3474_p3 }
  0xcf   : > { %p3477_p10 = pnand %p3476_p0, %p3470_p12 }
  0xd1   : > { %3480 = shalt.err (!%p3477_p10)
}
  0xd2   : > { %p4692_p13 = scmp.ne.s32.totalorder %s4671_s27, 0  ;;  %s4693_s15 = smov 12  }
  0xd3   : > { %s4694_s28 = smov 192   ;;  %s4695_s11 = scalar_lea.sflag [#allocation6], %s3860_s13 }
  0xd4   : > { %3043 = dma.hbm_to_vmem [thread:$0]  (!%p4692_p13), %s4086_s4, 3072, %s4089_s10, %s4695_s11, %s4694_s28, %s4694_s28, %s4693_s15  }
  0xd5   : > { %s3481_s21 = scalar_lea.hbm %s3886_s9, 16  ;;  %s3486_s14 = scalar_lea.hbm %s4672_s7, 32 }
  0xd6   : > { %p3482_p2 = scmp.ne.s32.totalorder %s3886_s9, %s3481_s21  ;;  %p3487_p4 = scmp.lt.u32.totalorder %s3886_s9, %s4672_s7 }
  0xd7   : > { %p3488_p8 = scmp.lt.u32.totalorder %s3486_s14, %s3481_s21  ;;  %p3490_p7 = scmp.lt.u32.totalorder %s3481_s21, %s3886_s9 }
  0xd8   : > { %p3484_p1 = pnand %p3482_p2, %p3893_p11 }
  0xd9   : > { %p3489_p5 = por %p3488_p8, %p3487_p4 }
  0xda   : > { %p3485_p6 = pneg %p3484_p1 }
  0xdb   : > { %p3491_p12 = por %p3490_p7, %p3489_p5 }
  0xdd   : > { %p3492_p3 = pnand %p3491_p12, %p3485_p6 }
  0xdf   : > { %3495 = shalt.err (!%p3492_p3)
}
  0xe0   : > { %s3496_s4 = scalar_lea.vmem %s564_s22, 16  ;;  %s3688_s10 = smov [#allocation10]  }
  0xe1   : > { %p3497_p9 = scmp.ne.s32.totalorder %s564_s22, %s3496_s4  ;;  %s3501_s12 = sshll.u32 %s3688_s10, 4  ;;  %s3502_s12 = int_to_ptr.vmem [resolvable:$false] %s3501_s12 }
  0xe2   : > { %s3503_s30 = scalar_lea.vmem %s3502_s12, 32  ;;  %p3504_p2 = scmp.lt.s32.totalorder %s564_s22, %s3502_s12 }
  0xe3   : > { %p3499_p0 = pnand %p3497_p9, %p3893_p11  ;;  %p3505_p1 = scmp.lt.s32.totalorder %s3503_s30, %s3496_s4 }
  0xe5   : > { %p3500_p10 = pneg %p3499_p0  ;;  %p3506_p13 = por %p3505_p1, %p3504_p2 }
  0xe7   : > { %p3507_p4 = pnand %p3506_p13, %p3500_p10 }
  0xe9   : > { %3510 = shalt.err (!%p3507_p4)
}
  0xea   : > { %p4696_p8 = scmp.ne.s32.totalorder %s4671_s27, 0  ;;  %s4697_s29 = scalar_lea.sflag [#allocation9], %s3860_s13 }
  0xeb   : > { %s4698_s11 = sld [smem:[#allocation46_spill]]  ;;  %s602_s2 = scalar_lea.vmem [#allocation13], %s3881_s20 }
  0xec   : > { %3049 = dma.hbm_to_vmem [thread:$0]  (!%p4696_p8), %s3886_s9, 16, %s564_s22, %s4697_s29  }
  0xed   : > { %s609_s19 = sshll.u32 %s602_s2, 4  ;;  %s4147_s19 = int_to_ptr.vmem [resolvable:$true] %s609_s19 }
  0xf1   : > { %s4144_s21 = scalar_lea.hbm %s4698_s11, %s3934_s6  ;;  %s3516_s9 = scalar_lea.hbm %s4698_s11, 6144 }
  0xf2   : > { %s3511_s14 = scalar_lea.hbm %s4144_s21, 3072  ;;  %p3517_p7 = scmp.lt.u32.totalorder %s4144_s21, %s4698_s11 }
  0xf3   : > { %p3512_p13 = scmp.ne.s32.totalorder %s4144_s21, %s3511_s14  ;;  %p3518_p12 = scmp.lt.u32.totalorder %s3516_s9, %s3511_s14 }
  0xf4   : > { %p3520_p9 = scmp.lt.u32.totalorder %s3511_s14, %s4144_s21 }
  0xf5   : > { %p3514_p6 = pnand %p3512_p13, %p3893_p11  ;;  %p3519_p3 = por %p3518_p12, %p3517_p7 }
  0xf7   : > { %p3515_p5 = pneg %p3514_p6  ;;  %p3521_p0 = por %p3520_p9, %p3519_p3 }
  0xf9   : > { %p3522_p10 = pnand %p3521_p0, %p3515_p5 }
  0xfb   : > { %3525 = shalt.err (!%p3522_p10)
}
  0xfc   : > { %s3526_s20 = scalar_lea.vmem %s4147_s19, 3072  ;;  %s3689_s4 = smov [#allocation13]  }
  0xfd   : > { %p3527_p2 = scmp.ne.s32.totalorder %s4147_s19, %s3526_s20  ;;  %s3531_s10 = sshll.u32 %s3689_s4, 4  ;;  %s3532_s10 = int_to_ptr.vmem [resolvable:$false] %s3531_s10 }
  0xfe   : > { %s3533_s12 = scalar_lea.vmem %s3532_s10, 6144  ;;  %p3534_p13 = scmp.lt.s32.totalorder %s4147_s19, %s3532_s10 }
  0xff   : > { %p3529_p1 = pnand %p3527_p2, %p3893_p11  ;;  %p3535_p6 = scmp.lt.s32.totalorder %s3533_s12, %s3526_s20 }
 0x101   : > { %p3530_p4 = pneg %p3529_p1  ;;  %p3536_p7 = por %p3535_p6, %p3534_p13 }
 0x103   : > { %p3537_p12 = pnand %p3536_p7, %p3530_p4 }
 0x105   : > { %3540 = shalt.err (!%p3537_p12)
}
 0x106   : > { %s4699_s30 = smov 4   ;;  %s4700_s29 = smov 64  }
 0x107   : > { %s4701_s15 = scalar_lea.sflag [#allocation12], %s3860_s13  ;;  %s4702_s1 = sld [smem:[#allocation32_spill]] }
 0x108   : > { %3055 = dma.hbm_to_vmem [thread:$0]  (!%p4696_p8), %s4144_s21, 3072, %s4147_s19, %s4701_s15, %s4700_s29, %s4700_s29, %s4699_s30  }
 0x10d   : > { %p4703_p11 = scmp.ne.s32.totalorder %s4702_s1, 0 }
 0x10e   : > { %s4178_s28 = sand.u32 (!%p4703_p11), 1, %s3651_s17   ;;  %p4704_p5 = scmp.ne.s32.totalorder (!%p4703_p11), %s4683_s26, 0 }
 0x10f   : > { %627 = sbr.rel (%p4703_p11) target bundleno = 3643 (0xe3b), region = 76  ;;  %s4635_s2 = sshll.u32 (!%p4703_p11), %s4178_s28, 4 }
 0x110   : > { %s630_s27 = scalar_lea.sflag (!%p4703_p11), [#allocation3], %s4178_s28  ;;  %s4184_s14 = scalar_lea.vmem (!%p4703_p11), [#allocation2], %s4635_s2 }
 0x116   : > { %3614 = dma.done.wait (%p4704_p5), %s630_s27, 256  }
 0x117   : > { %3616 = vsyncadd (%p4704_p5), %s630_s27, 4294967040  ;;  %s4705_s13 = sld [smem:[#allocation20_spill]]  ;;  %s4706_s21 = sld [smem:[#allocation30_spill]] }
 0x118   : > { %s638_s19 = sand.u32 1, %s3828_s24  }
 0x119   : > { %s639_s22 = scalar_lea.sflag [#allocation6], %s638_s19 }
 0x11d   : > { %s4192_s8 = sand.u32 1, %s4705_s13   ;;  %p4707_p8 = scmp.ne.s32.totalorder %s4706_s21, 0 }
 0x11f   : > { %3618 = dma.done.wait (%p4707_p8), %s639_s22, 3088  }
 0x120   : > { %3620 = vsyncadd (%p4707_p8), %s639_s22, 4294964208  ;;  %s3016_s0 = smul.u32 192, %s4192_s8  ;;  %s2699_s26 = sshll.u32 %s4192_s8, 6 }
 0x121   : > { %s656_s20 = scalar_lea.sflag [#allocation9], %s638_s19  ;;  %s4203_s4 = scalar_lea.vmem [#allocation8], %s2699_s26 }
 0x122   : > { %s4201_s6 = scalar_lea.vmem [#allocation7], %s3016_s0 }
 0x123   : > { %3622 = dma.done.wait (%p4707_p8), %s656_s20, 1040  }
 0x124   : > { %3624 = vsyncadd (%p4707_p8), %s656_s20, 4294966256  ;;  %s673_s10 = scalar_lea.sflag [#allocation12], %s638_s19  ;;  %s4210_s12 = scalar_lea.vmem [#allocation11], %s3016_s0 }
 0x125   : > { %3626 = dma.done.wait (%p4707_p8), %s673_s10, 6144  }
 0x126   : > { %3628 = vsyncadd (%p4707_p8), %s673_s10, 4294961152  ;;  %s4708_s30 = sld [smem:[#allocation25_spill]]  ;;  %s4710_s26 = sld [smem:[#allocation41_spill]] }
 0x127   : > { %s4711_s24 = sld [smem:[#allocation42_spill]]  ;;  %s4712_s11 = sld [smem:[#allocation47_spill]] }
 0x128   : > { %s4713_s1 = sld [smem:[#allocation45_spill]]  ;;  %s4242_s16 = scalar_lea.vmem [#allocation13], %s3016_s0 }
 0x129   : > { %s4714_s27 = sshll.u32 %s4178_s28, 4 }
 0x12a   : > { %s4246_s13 = scalar_lea.vmem [#allocation14], %s4714_s27 }
 0x12c   : > { %p774_p3 = scmp.lt.s32.totalorder %s4708_s30, 1  ;;  %p2701_p9 = scmp.ne.s32.totalorder %s4708_s30, 0 }
 0x12d   : > { %v795_v0 = vld [vmem:[%s4184_s14] sm:$0xff] (!%p2701_p9)  ;;  %v796_v1 = vld [vmem:[%s4184_s14 + $0x8] sm:$0xff] (!%p2701_p9) }
 0x12e   : > { %s4218_s29 = scalar_select %p774_p3, %s4708_s30, 1 }
 0x12f   : > { %794 = sbr.rel (%p2701_p9) target bundleno = 310 (0x136), region = 108  ;;  %797 = vst [vmem:[%s4246_s13] sm:$0xff] (!%p2701_p9), %v795_v0  ;;  %798 = vst [vmem:[%s4246_s13 + $0x8] sm:$0xff] (!%p2701_p9), %v796_v1 }
 0x130   : > { %s779_s21 = scalar_lea.vmem %s4710_s26, %s4218_s29  ;;  %s782_s9 = scalar_lea.vmem %s4711_s24, %s4218_s29 }
 0x131   : > { %s3017_s2 = smul.u32 3, %s4218_s29  ;;  %s789_s18 = scalar_lea.vmem %s4712_s11, %s4218_s29 }
 0x133   : > { %s4240_s25 = scalar_lea.vmem %s4713_s1, %s3017_s2 }
 0x136 PF: > { %v4254_v2 = vld [vmem:[%s4246_s13] sm:$0xff]  ;;  %v4257_v3 = vld [vmem:[%s4246_s13 + $0x8] sm:$0xff]  ;;  %v3690_v6 = vmov 0.0   ;;  %v3691_v32 = vmov 0   ;;  %vm3692_vm0 = vmmov 0   ;;  %s4715_s17 = sld [smem:[#allocation37_spill]] }
 0x137   : > { %803 = vadd.xlane.f32.xlu0 %v4254_v2  ;;  %v3179_v4 = vld [vmem:[%s4201_s6 + $0x4] ss:$12 sps:$4 sm:$0xff]   ;;  %v3181_v5 = vld [vmem:[%s4201_s6] ss:$12 sps:$4 sm:$0xff]   ;;  %2882 = vmatprep.subr.bf16.mxu1 %v3690_v6  ;;  %v3182_v7 = vld [vmem:[%s4201_s6 + $0x8] ss:$12 sps:$4 sm:$0xff]  }
 0x138   : > { %v3183_v8 = vld [vmem:[%s4201_s6 + $0x1c] ss:$12 sps:$4 sm:$0xff]   ;;  %1003 = vmatprep.subr.bf16.mxu0 %v3179_v4  ;;  %2883 = vmatpush3.bf16.msra.mxu1 %v3182_v7  ;;  %v3185_v17 = vld [vmem:[%s4201_s6 + $0x18] ss:$12 sps:$4 sm:$0xff]   ;;  %v3186_v18 = vld [vmem:[%s4201_s6 + $0x20] ss:$12 sps:$4 sm:$0xff]  }
 0x139   : > { %1004 = vmatpush1.bf16.msra.mxu0 %v3181_v5  ;;  %2884 = vmatprep.subr.bf16.mxu1 %v3690_v6  ;;  %v3187_v19 = vld [vmem:[%s4201_s6 + $0x34] ss:$12 sps:$4 sm:$0xff]   ;;  %v3189_v20 = vld [vmem:[%s4201_s6 + $0x30] ss:$12 sps:$4 sm:$0xff]   ;;  %v3190_v21 = vld [vmem:[%s4201_s6 + $0x38] ss:$12 sps:$4 sm:$0xff]  }
 0x13a   : > { %1005 = vmatprep.subr.bf16.mxu0 %v3183_v8  ;;  %v3191_v22 = vld [vmem:[%s4201_s6 + $0x4c] ss:$12 sps:$4 sm:$0xff]   ;;  %v3193_v23 = vld [vmem:[%s4201_s6 + $0x48] ss:$12 sps:$4 sm:$0xff]   ;;  %v3194_v24 = vld [vmem:[%s4201_s6 + $0x50] ss:$12 sps:$4 sm:$0xff]   ;;  %1035 = vmatprep.mubr.bf16.mxu0 %v3691_v32 }
 0x13b   : > { %805 = vadd.xlane.f32.xlu0 %v4257_v3  ;;  %v3195_v25 = vld [vmem:[%s4201_s6 + $0x64] ss:$12 sps:$4 sm:$0xff]   ;;  %v3197_v26 = vld [vmem:[%s4201_s6 + $0x60] ss:$12 sps:$4 sm:$0xff]   ;;  %v3198_v27 = vld [vmem:[%s4201_s6 + $0x68] ss:$12 sps:$4 sm:$0xff]   ;;  %2898 = vmatprep.mubr.msk.bf16.mxu1 %vm3692_vm0, %v3690_v6 }
 0x13c   : > { %2885 = vmatpush3.bf16.msra.mxu1 %v3186_v18  ;;  %v3199_v28 = vld [vmem:[%s4201_s6 + $0x7c] ss:$12 sps:$4 sm:$0xff]   ;;  %v3201_v29 = vld [vmem:[%s4201_s6 + $0x78] ss:$12 sps:$4 sm:$0xff]   ;;  %v3202_v30 = vld [vmem:[%s4201_s6 + $0x80] ss:$12 sps:$4 sm:$0xff]   ;;  %s4716_s11 = scalar_lea.vmem %s4715_s17, %s4218_s29 }
 0x13d   : > { %1006 = vmatpush1.bf16.msra.mxu0 %v3185_v17  ;;  %2886 = vmatprep.subr.bf16.mxu1 %v3690_v6  ;;  %v3203_v31 = vld [vmem:[%s4201_s6 + $0x94] ss:$12 sps:$4 sm:$0xff]   ;;  %v3205_v33 = vld [vmem:[%s4201_s6 + $0x90] ss:$12 sps:$4 sm:$0xff]   ;;  %v3206_v34 = vld [vmem:[%s4201_s6 + $0x98] ss:$12 sps:$4 sm:$0xff]  }
 0x13e   : > { %1007 = vmatprep.subr.bf16.mxu0 %v3187_v19  ;;  %v3207_v35 = vld [vmem:[%s4201_s6 + $0xac] ss:$12 sps:$4 sm:$0xff]   ;;  %v3209_v36 = vld [vmem:[%s4201_s6 + $0xa8] ss:$12 sps:$4 sm:$0xff]   ;;  %v3210_v37 = vld [vmem:[%s4201_s6 + $0xb0] ss:$12 sps:$4 sm:$0xff]  }
 0x13f   : > { %v2702_v46 = vld [vmem:[%s4716_s11] ss:$0 sm:$0xff]  ;;  %s4717_s2 = scalar_lea.vmem [#allocation5], %s4192_s8  ;;  %vm1090_vm1 = vcmask 261120   ;;  %vm1138_vm2 = vcmask 130048   ;;  %s3693_s14 = smov 96  }
 0x140   : > { %2887 = vmatpush3.bf16.msra.mxu1 %v3190_v21  ;;  %v2703_v50 = vld [vmem:[%s4717_s2] ss:$0 sm:$0xff]  ;;  %s3694_s0 = smov 64   ;;  %s3695_s6 = smov 32   ;;  %vm1598_vm3 = vcmask 523264   ;;  %vm1601_vm4 = vcmask 785408  }
 0x141   : > { %1008 = vmatpush1.bf16.msra.mxu0 %v3189_v20  ;;  %2888 = vmatprep.subr.bf16.mxu1 %v3690_v6  ;;  %s4720_s26 = scalar_lea.vmem [#allocation10], %s4192_s8 }
 0x142   : > { %1009 = vmatprep.subr.bf16.mxu0 %v3191_v22 }
 0x144   : > { %2889 = vmatpush3.bf16.msra.mxu1 %v3194_v24 }
 0x145   : > { %1010 = vmatpush1.bf16.msra.mxu0 %v3193_v23  ;;  %2890 = vmatprep.subr.bf16.mxu1 %v3690_v6 }
 0x146   : > { %1011 = vmatprep.subr.bf16.mxu0 %v3195_v25 }
 0x148   : > { %2891 = vmatpush3.bf16.msra.mxu1 %v3198_v27 }
 0x149   : > { %1012 = vmatpush1.bf16.msra.mxu0 %v3197_v26  ;;  %2892 = vmatprep.subr.bf16.mxu1 %v3690_v6 }
 0x14a   : > { %1013 = vmatprep.subr.bf16.mxu0 %v3199_v28 }
 0x14c   : > { %2893 = vmatpush3.bf16.msra.mxu1 %v3202_v30 }
 0x14d   : > { %1014 = vmatpush1.bf16.msra.mxu0 %v3201_v29  ;;  %2894 = vmatprep.subr.bf16.mxu1 %v3690_v6 }
 0x14e   : > { %1015 = vmatprep.subr.bf16.mxu0 %v3203_v31 }
 0x150   : > { %2895 = vmatpush3.bf16.msra.mxu1 %v3206_v34 }
 0x151   : > { %1016 = vmatpush1.bf16.msra.mxu0 %v3205_v33  ;;  %2896 = vmatprep.subr.bf16.mxu1 %v3690_v6 }
 0x152   : > { %1017 = vmatprep.subr.bf16.mxu0 %v3207_v35 }
 0x154   : > { %2897 = vmatpush3.bf16.msra.mxu1 %v3210_v37 }
 0x155   : > { %1018 = vmatpush1.bf16.msra.mxu0 %v3209_v36  ;;  %2902 = vmatprep.subr.bf16.mxu1 %v3690_v6 }
 0x156   : > { %2926 = vmatprep.subr.bf16.mxu0 %v3690_v6 }
 0x1c4   : > { %v804_v9 = vpop.xlane.xlu0 %803 }
 0x1c5   : > { %v808_v10 = vmul.f32 0.0078125, %v804_v9 }
 0x1c7   : > { %v4268_v11 = vsub.f32 %v4254_v2, %v808_v10 }
 0x1c8   : > { %v806_v12 = vpop.xlane.xlu0 %805 }
 0x1c9   : > { %v809_v13 = vmul.f32 0.0078125, %v806_v12  ;;  %v812_v14 = vmul.f32 %v4268_v11, %v4268_v11 }
 0x1cb   : > { %v4273_v15 = vsub.f32 %v4257_v3, %v809_v13  ;;  %814 = vadd.xlane.f32.xlu1 %v812_v14 }
 0x1cd   : > { %v813_v16 = vmul.f32 %v4273_v15, %v4273_v15 }
 0x1cf   : > { %816 = vadd.xlane.f32.xlu1 %v813_v16 }
 0x258   : > { %v815_v38 = vpop.xlane.xlu1 %814 }
 0x259   : > { %v818_v39 = vmul.f32 0.0078125, %v815_v38 }
 0x25b   : > { %v820_v40 = vadd.f32 1e-05, %v818_v39 }
 0x25c   : > { %v817_v41 = vpop.xlane.xlu1 %816 }
 0x25d   : > { %3275 = vrsqrt.f32 %v820_v40  ;;  %v819_v42 = vmul.f32 0.0078125, %v817_v41 }
 0x25f   : > { %v821_v43 = vadd.f32 1e-05, %v819_v42 }
 0x261   : > { %3277 = vrsqrt.f32 %v821_v43 }
 0x267   : > { %v3276_v44 = vpop.eup %3275 }
 0x268   : > { %v824_v45 = vmul.f32 %v3276_v44, %v4268_v11 }
 0x26a   : > { %v832_v49 = vmul.f32 %v2702_v46, %v824_v45 }
 0x26b   : > { %v3278_v47 = vpop.eup %3277 }
 0x26c   : > { %v825_v48 = vmul.f32 %v3278_v47, %v4273_v15  ;;  %v840_v52 = vadd.f32 %v2703_v50, %v832_v49 }
 0x26e   : > { %v833_v51 = vmul.f32 %v2702_v46, %v825_v48 }
 0x270   : > { %v841_v53 = vadd.f32 %v2703_v50, %v833_v51 }
 0x272   : > { %v842_v54 = vpack.c.bf16 %v841_v53, %v840_v52 }
 0x274   : > { %1036 = vmatmul.mubr.bf16.vlgmr.msra.gmra.mrb[0].mxu0 %v842_v54  ;;  %2899 = vmatmul.mubr.bf16.vlgmr.msra.gmra.mrb[0].mxu1 %v842_v54 }
 0x275   : > { %2904 = vmatprep.mubr.msk.bf16.mxu1 %vm3692_vm0, %v3690_v6  ;;  %2928 = vmatprep.mubr.msk.bf16.mxu0 %vm3692_vm0, %v3690_v6 }
 0x347   : > { %v1037_v55 = vpop.f32.mrb[0].mxu0  ;;  %v1080_v56 = vpop.f32.mrb[0].mxu1 }
 0x348   : > { %v1039_v57 = vpop.f32.mrb[1].mxu0  ;;  %v2900_v58 = vpop.f32.mrb[1].mxu1 }
 0x349   : > { %v1041_v59 = vpop.f32.mrb[2].mxu0  ;;  %v1083_v60 = vpop.f32.mrb[2].mxu1 }
 0x34a   : > { %v1087_v61 = vpack.c.bf16 %v1041_v59, %v1037_v55  ;;  %v4321_v62 = vpack.c.bf16 %v1083_v60, %v1080_v56  ;;  %v1043_v63 = vpop.f32.mrb[3].mxu0  ;;  %v2901_v0 = vpop.f32.mrb[3].mxu1 }
 0x34b   : > { %v1088_v1 = vpack.c.bf16 %v1043_v63, %v1039_v57 }
 0x34d   : > { %v1095_v4 = vsel %vm1090_vm1, %v1088_v1, 0 }
 0x34e   : > { %2903 = vmatpush3.bf16.xpose.msra.mxu1 %v1095_v4 }
 0x34f   : > { %2908 = vmatprep.subr.bf16.mxu1 %v3690_v6 }
 0x355   : > { %2905 = vmatmul.mubr.msk.bf16.vlgmr.msra.gmra.mrb[4].mxu1 %vm1090_vm1, %v1087_v61 }
 0x356   : > { %2909 = vmatpush3.bf16.msra.mxu1 %v4321_v62  ;;  %2910 = vmatprep.mubr.msk.bf16.mxu1 %vm3692_vm0, %v3690_v6 }
 0x357   : > { %2914 = vmatprep.subr.bf16.mxu1 %v3690_v6 }
 0x428   : > { %v1131_v5 = vpop.f32.mrb[4].mxu1 }
 0x429   : > { %v2906_v7 = vpop.f32.mrb[5].mxu1  ;;  %v1139_v8 = vsel %vm1138_vm2, %v1131_v5, -inf }
 0x42a   : > { %1140 = vmax.xlane.f32.xlu0 %v1139_v8  ;;  %v1134_v9 = vpop.f32.mrb[6].mxu1 }
 0x42b   : > { %v2907_v10 = vpop.f32.mrb[7].mxu1  ;;  %v1142_v11 = vsel %vm1138_vm2, %v1134_v9, -inf }
 0x42c   : > { %1143 = vmax.xlane.f32.xlu1 %v1142_v11 }
 0x4b7   : > { %v1141_v12 = vpop.xlane.xlu0 %1140 }
 0x4b8   : > { %v1145_v13 = vsub.f32 %v1131_v5, %v1141_v12 }
 0x4b9   : > { %v1144_v14 = vpop.xlane.xlu1 %1143 }
 0x4ba   : > { %v1147_v15 = vmul.f32 1.442695, %v1145_v13  ;;  %v1146_v16 = vsub.f32 %v1134_v9, %v1144_v14 }
 0x4bc   : > { %3279 = vpow2.f32 %v1147_v15  ;;  %v1149_v17 = vmul.f32 1.442695, %v1146_v16 }
 0x4be   : > { %3281 = vpow2.f32 %v1149_v17 }
 0x4c6   : > { %v3280_v18 = vpop.eup %3279 }
 0x4c7   : > { %v1151_v19 = vsel %vm1138_vm2, %v3280_v18, 0.0 }
 0x4c8   : > { %v3282_v20 = vpop.eup %3281  ;;  %1152 = vadd.xlane.f32.xlu0 %v1151_v19 }
 0x4c9   : > { %v1154_v21 = vsel %vm1138_vm2, %v3282_v20, 0.0 }
 0x4ca   : > { %1155 = vadd.xlane.f32.xlu1 %v1154_v21 }
 0x4db   : > { %1207 = vrot.lane.b32.xlu1 %v1087_v61, %s3693_s14 }
 0x4de   : > { %1210 = vrot.lane.b32.xlu0 %v1088_v1, %s3693_s14 }
 0x4df   : > { %1332 = vrot.lane.b32.xlu1 %v1088_v1, %s3694_s0 }
 0x4e2   : > { %1453 = vrot.lane.b32.xlu0 %v1088_v1, %s3695_s6 }
 0x4e3   : > { %1330 = vrot.lane.b32.xlu1 %v1087_v61, %s3694_s0 }
 0x4e7   : > { %1451 = vrot.lane.b32.xlu1 %v1087_v61, %s3695_s6 }
 0x555   : > { %v1153_v22 = vpop.xlane.xlu0 %1152 }
 0x556   : > { %3283 = vrcp.f32 %v1153_v22 }
 0x557   : > { %v1156_v23 = vpop.xlane.xlu1 %1155 }
 0x558   : > { %3285 = vrcp.f32 %v1156_v23 }
 0x559   : > { %v1211_v25 = vpop.permute.xlu0 %1210 }
 0x55a   : > { %v1216_v35 = vsel %vm1090_vm1, %v1211_v25, 0 }
 0x55b   : > { %v1208_v24 = vpop.permute.xlu1 %1207 }
 0x55d   : > { %v1454_v33 = vpop.permute.xlu0 %1453 }
 0x55e   : > { %v1459_v37 = vsel %vm1090_vm1, %v1454_v33, 0 }
 0x55f   : > { %v1333_v26 = vpop.permute.xlu1 %1332 }
 0x560   : > { %v3284_v27 = vpop.eup %3283  ;;  %v1338_v28 = vsel %vm1090_vm1, %v1333_v26, 0 }
 0x561   : > { %2927 = vmatpush3.bf16.xpose.msra.mxu0 %v1338_v28  ;;  %v1159_v30 = vmul.f32 %v3284_v27, %v3280_v18 }
 0x562   : > { %v3286_v29 = vpop.eup %3285  ;;  %2938 = vmatprep.subr.bf16.mxu0 %v3690_v6 }
 0x563   : > { %v1160_v31 = vmul.f32 %v3286_v29, %v3282_v20  ;;  %v1331_v36 = vpop.permute.xlu1 %1330 }
 0x565   : > { %v1161_v34 = vpack.c.bf16 %v1160_v31, %v1159_v30 }
 0x567   : > { %2911 = vmatmul.mubr.msk.bf16.vlgmr.msra.gmra.mrb[8].mxu1 %vm1138_vm2, %v1161_v34  ;;  %v1452_v38 = vpop.permute.xlu1 %1451 }
 0x568   : > { %2915 = vmatpush3.bf16.xpose.msra.mxu1 %v1216_v35  ;;  %2929 = vmatmul.mubr.msk.bf16.vlgmr.msra.gmra.mrb[4].mxu0 %vm1090_vm1, %v1331_v36 }
 0x569   : > { %2939 = vmatpush3.bf16.xpose.msra.mxu0 %v1459_v37  ;;  %2916 = vmatprep.mubr.msk.bf16.mxu1 %vm3692_vm0, %v3690_v6 }
 0x56a   : > { %2940 = vmatprep.mubr.msk.bf16.mxu0 %vm3692_vm0, %v3690_v6  ;;  %2920 = vmatprep.subr.bf16.mxu1 %v3690_v6 }
 0x56b   : > { %2950 = vmatprep.subr.bf16.mxu0 %v3690_v6 }
 0x56f   : > { %2917 = vmatmul.mubr.msk.bf16.vlgmr.msra.gmra.mrb[12].mxu1 %vm1090_vm1, %v1208_v24 }
 0x570   : > { %2941 = vmatmul.mubr.msk.bf16.vlgmr.msra.gmra.mrb[8].mxu0 %vm1090_vm1, %v1452_v38  ;;  %2922 = vmatprep.mubr.msk.bf16.mxu1 %vm3692_vm0, %v3690_v6 }
 0x571   : > { %2966 = vmatprep.mubr.msk.bf16.mxu0 %vm3692_vm0, %v3690_v6 }
 0x63a   : > { %v4358_v39 = vpop.f32.mrb[8].mxu1 }
 0x63b   : > { %v2912_v40 = vpop.f32.mrb[9].mxu1  ;;  %v1374_v41 = vpop.f32.mrb[4].mxu0 }
 0x63c   : > { %v4360_v42 = vpop.f32.mrb[10].mxu1  ;;  %v2930_v43 = vpop.f32.mrb[5].mxu0  ;;  %v1381_v57 = vsel %vm1138_vm2, %v1374_v41, -inf }
 0x63d   : > { %v2913_v44 = vpop.f32.mrb[11].mxu1  ;;  %v1377_v45 = vpop.f32.mrb[6].mxu0 }
 0x63e   : > { %v2931_v46 = vpop.f32.mrb[7].mxu0  ;;  %v1384_v59 = vsel %vm1138_vm2, %v1377_v45, -inf }
 0x642   : > { %v1252_v47 = vpop.f32.mrb[12].mxu1 }
 0x643   : > { %v2918_v48 = vpop.f32.mrb[13].mxu1  ;;  %v1495_v49 = vpop.f32.mrb[8].mxu0  ;;  %v1259_v50 = vsel %vm1138_vm2, %v1252_v47, -inf }
 0x644   : > { %v2942_v51 = vpop.f32.mrb[9].mxu0  ;;  %1260 = vmax.xlane.f32.xlu0 %v1259_v50  ;;  %v1255_v52 = vpop.f32.mrb[14].mxu1  ;;  %v1502_v60 = vsel %vm1138_vm2, %v1495_v49, -inf }
 0x645   : > { %v2919_v53 = vpop.f32.mrb[15].mxu1  ;;  %v1498_v54 = vpop.f32.mrb[10].mxu0  ;;  %v1262_v55 = vsel %vm1138_vm2, %v1255_v52, -inf }
 0x646   : > { %v2943_v56 = vpop.f32.mrb[11].mxu0  ;;  %1263 = vmax.xlane.f32.xlu1 %v1262_v55  ;;  %v1505_v58 = vsel %vm1138_vm2, %v1498_v54, -inf }
 0x648   : > { %1382 = vmax.xlane.f32.xlu0 %v1381_v57  ;;  %v3211_v57 = vld [vmem:[%s4203_s4] sm:$0xff]  }
 0x649   : > { %2951 = vmatpush3.bf16.msra.mxu0 %v3211_v57  ;;  %v3227_v57 = vld [vmem:[%s4210_s12 + $0x30] ss:$12 sps:$4 sm:$0xff]  }
 0x64a   : > { %1506 = vmax.xlane.f32.xlu1 %v1505_v58  ;;  %v3212_v58 = vld [vmem:[%s4203_s4 + $0x8] sm:$0xff]   ;;  %2952 = vmatprep.subr.bf16.mxu0 %v3690_v6 }
 0x64c   : > { %1385 = vmax.xlane.f32.xlu0 %v1384_v59  ;;  %v3213_v59 = vld [vmem:[%s4203_s4 + $0x10] sm:$0xff]  }
 0x64d   : > { %2953 = vmatpush3.bf16.msra.mxu0 %v3212_v58  ;;  %v3230_v58 = vld [vmem:[%s4210_s12 + $0x38] ss:$12 sps:$4 sm:$0xff]  }
 0x64e   : > { %2954 = vmatprep.subr.bf16.mxu0 %v3690_v6 }
 0x650   : > { %1503 = vmax.xlane.f32.xlu0 %v1502_v60  ;;  %v3214_v60 = vld [vmem:[%s4203_s4 + $0x18] sm:$0xff]  }
 0x651   : > { %2955 = vmatpush3.bf16.msra.mxu0 %v3213_v59  ;;  %v3233_v59 = vld [vmem:[%s4210_s12 + $0x4c] ss:$12 sps:$4 sm:$0xff]  }
 0x652   : > { %2956 = vmatprep.subr.bf16.mxu0 %v3690_v6 }
 0x655   : > { %2957 = vmatpush3.bf16.msra.mxu0 %v3214_v60  ;;  %v3231_v60 = vld [vmem:[%s4210_s12 + $0x48] ss:$12 sps:$4 sm:$0xff]  }
 0x656   : > { %2958 = vmatprep.subr.bf16.mxu0 %v3690_v6 }
 0x6d1   : > { %v1261_v61 = vpop.xlane.xlu0 %1260 }
 0x6d2   : > { %v1265_v10 = vsub.f32 %v1252_v47, %v1261_v61  ;;  %v3215_v61 = vld [vmem:[%s4203_s4 + $0x20] sm:$0xff]  }
 0x6d3   : > { %v1264_v63 = vpop.xlane.xlu1 %1263  ;;  %2959 = vmatpush3.bf16.msra.mxu0 %v3215_v61  ;;  %v3234_v61 = vld [vmem:[%s4210_s12 + $0x50] ss:$12 sps:$4 sm:$0xff]  }
 0x6d4   : > { %v1266_v11 = vsub.f32 %v1255_v52, %v1264_v63  ;;  %v1267_v16 = vmul.f32 1.442695, %v1265_v10  ;;  %2960 = vmatprep.subr.bf16.mxu0 %v3690_v6  ;;  %v3218_v10 = vld [vmem:[%s4203_s4 + $0x38] sm:$0xff]  }
 0x6d5   : > { %v1383_v0 = vpop.xlane.xlu0 %1382 }
 0x6d6   : > { %v1387_v1 = vsub.f32 %v1374_v41, %v1383_v0  ;;  %v1269_v17 = vmul.f32 1.442695, %v1266_v11  ;;  %v3216_v0 = vld [vmem:[%s4203_s4 + $0x28] sm:$0xff]  }
 0x6d7   : > { %v1507_v4 = vpop.xlane.xlu1 %1506  ;;  %2961 = vmatpush3.bf16.msra.mxu0 %v3216_v0  ;;  %v3238_v0 = vld [vmem:[%s4210_s12 + $0x68] ss:$12 sps:$4 sm:$0xff]  }
 0x6d8   : > { %v1389_v5 = vmul.f32 1.442695, %v1387_v1  ;;  %v1509_v7 = vsub.f32 %v1498_v54, %v1507_v4  ;;  %2962 = vmatprep.subr.bf16.mxu0 %v3690_v6 }
 0x6d9   : > { %v1386_v8 = vpop.xlane.xlu0 %1385 }
 0x6da   : > { %3287 = vpow2.f32 %v1389_v5  ;;  %v1388_v9 = vsub.f32 %v1377_v45, %v1386_v8  ;;  %v1512_v12 = vmul.f32 1.442695, %v1509_v7  ;;  %v3217_v7 = vld [vmem:[%s4203_s4 + $0x30] sm:$0xff]  }
 0x6db   : > { %2963 = vmatpush3.bf16.msra.mxu0 %v3217_v7  ;;  %v3245_v7 = vld [vmem:[%s4210_s12 + $0x94] ss:$12 sps:$4 sm:$0xff]  }
 0x6dc   : > { %v1391_v13 = vmul.f32 1.442695, %v1388_v9  ;;  %2964 = vmatprep.subr.bf16.mxu0 %v3690_v6 }
 0x6dd   : > { %v1504_v14 = vpop.xlane.xlu0 %1503 }
 0x6de   : > { %3289 = vpow2.f32 %v1391_v13  ;;  %v1508_v15 = vsub.f32 %v1495_v49, %v1504_v14 }
 0x6df   : > { %3291 = vpow2.f32 %v1512_v12  ;;  %2965 = vmatpush3.bf16.msra.mxu0 %v3218_v10  ;;  %v3249_v10 = vld [vmem:[%s4210_s12 + $0xac] ss:$12 sps:$4 sm:$0xff]  }
 0x6e0   : > { %v1510_v18 = vmul.f32 1.442695, %v1508_v15  ;;  %2970 = vmatprep.subr.bf16.mxu0 %v3690_v6 }
 0x6e2   : > { %3293 = vpow2.f32 %v1510_v18 }
 0x6e3   : > { %3295 = vpow2.f32 %v1267_v16 }
 0x6e4   : > { %v3288_v19 = vpop.eup %3287  ;;  %3297 = vpow2.f32 %v1269_v17 }
 0x6e5   : > { %v1393_v20 = vsel %vm1138_vm2, %v3288_v19, 0.0 }
 0x6e6   : > { %1394 = vadd.xlane.f32.xlu0 %v1393_v20 }
 0x6e8   : > { %v3290_v21 = vpop.eup %3289 }
 0x6e9   : > { %v1396_v22 = vsel %vm1138_vm2, %v3290_v21, 0.0  ;;  %v3292_v23 = vpop.eup %3291 }
 0x6ea   : > { %1397 = vadd.xlane.f32.xlu1 %v1396_v22  ;;  %v1517_v27 = vsel %vm1138_vm2, %v3292_v23, 0.0 }
 0x6ec   : > { %v3294_v24 = vpop.eup %3293 }
 0x6ed   : > { %v3296_v25 = vpop.eup %3295  ;;  %v1514_v26 = vsel %vm1138_vm2, %v3294_v24, 0.0 }
 0x6ee   : > { %v3298_v28 = vpop.eup %3297  ;;  %1515 = vadd.xlane.f32.xlu0 %v1514_v26  ;;  %1518 = vadd.xlane.f32.xlu1 %v1517_v27  ;;  %v1271_v29 = vsel %vm1138_vm2, %v3296_v25, 0.0 }
 0x6ef   : > { %v1274_v30 = vsel %vm1138_vm2, %v3298_v28, 0.0 }
 0x6f2   : > { %1272 = vadd.xlane.f32.xlu0 %v1271_v29  ;;  %1275 = vadd.xlane.f32.xlu1 %v1274_v30 }
 0x703   : > { %1404 = vrot.lane.b32.xlu1 %v4321_v62, %s3694_s0 }
 0x707   : > { %1525 = vrot.lane.b32.xlu1 %v4321_v62, %s3695_s6 }
 0x708   : > { %1283 = vrot.lane.b32.xlu0 %v4321_v62, %s3693_s14 }
 0x773   : > { %v1395_v31 = vpop.xlane.xlu0 %1394 }
 0x777   : > { %v1398_v33 = vpop.xlane.xlu1 %1397 }
 0x77b   : > { %v1516_v34 = vpop.xlane.xlu0 %1515  ;;  %v1519_v35 = vpop.xlane.xlu1 %1518 }
 0x77f   : > { %v1273_v36 = vpop.xlane.xlu0 %1272  ;;  %v1276_v37 = vpop.xlane.xlu1 %1275 }
 0x780   : > { %3299 = vrcp.f32 %v1273_v36 }
 0x781   : > { %3301 = vrcp.f32 %v1276_v37 }
 0x782   : > { %3303 = vrcp.f32 %v1398_v33 }
 0x783   : > { %v1284_v38 = vpop.permute.xlu0 %1283  ;;  %3305 = vrcp.f32 %v1395_v31  ;;  %v1405_v46 = vpop.permute.xlu1 %1404 }
 0x784   : > { %2921 = vmatpush3.bf16.msra.mxu1 %v1284_v38  ;;  %3307 = vrcp.f32 %v1516_v34 }
 0x785   : > { %2932 = vmatprep.subr.bf16.mxu1 %v3690_v6  ;;  %3309 = vrcp.f32 %v1519_v35 }
 0x787   : > { %v1526_v53 = vpop.permute.xlu1 %1525 }
 0x78a   : > { %v3300_v40 = vpop.eup %3299 }
 0x78b   : > { %v3302_v41 = vpop.eup %3301  ;;  %v1279_v43 = vmul.f32 %v3300_v40, %v3296_v25 }
 0x78c   : > { %v1280_v44 = vmul.f32 %v3302_v41, %v3298_v28  ;;  %v3304_v45 = vpop.eup %3303 }
 0x78d   : > { %v3306_v47 = vpop.eup %3305  ;;  %v1402_v48 = vmul.f32 %v3304_v45, %v3290_v21  ;;  %v3221_v45 = vld [vmem:[%s4210_s12 + $0x4] ss:$12 sps:$4 sm:$0xff]  }
 0x78e   : > { %v1281_v62 = vpack.c.bf16 %v1280_v44, %v1279_v43  ;;  %v1401_v49 = vmul.f32 %v3306_v47, %v3288_v19  ;;  %v3308_v50 = vpop.eup %3307  ;;  %v3225_v47 = vld [vmem:[%s4210_s12 + $0x1c] ss:$12 sps:$4 sm:$0xff]  }
 0x78f   : > { %v3310_v52 = vpop.eup %3309  ;;  %v1522_v54 = vmul.f32 %v3308_v50, %v3294_v24 }
 0x790   : > { %2923 = vmatmul.mubr.msk.bf16.vlgmr.msra.gmra.mrb[16].mxu1 %vm1138_vm2, %v1281_v62  ;;  %v1403_v51 = vpack.c.bf16 %v1402_v48, %v1401_v49  ;;  %v1523_v55 = vmul.f32 %v3310_v52, %v3292_v23  ;;  %v3219_v62 = vld [vmem:[%s4210_s12] ss:$12 sps:$4 sm:$0xff]   ;;  %v3223_v48 = vld [vmem:[%s4210_s12 + $0x18] ss:$12 sps:$4 sm:$0xff]  }
 0x791   : > { %2933 = vmatpush3.bf16.msra.mxu1 %v1405_v46  ;;  %2934 = vmatprep.mubr.msk.bf16.mxu1 %vm3692_vm0, %v3690_v6  ;;  %v3222_v46 = vld [vmem:[%s4210_s12 + $0x8] ss:$12 sps:$4 sm:$0xff]  }
 0x792   : > { %2944 = vmatprep.subr.bf16.mxu1 %v3690_v6  ;;  %v1524_v56 = vpack.c.bf16 %v1523_v55, %v1522_v54  ;;  %v3226_v55 = vld [vmem:[%s4210_s12 + $0x20] ss:$12 sps:$4 sm:$0xff]  }
 0x798   : > { %2935 = vmatmul.mubr.msk.bf16.vlgmr.msra.gmra.mrb[20].mxu1 %vm1138_vm2, %v1403_v51 }
 0x799   : > { %2945 = vmatpush3.bf16.msra.mxu1 %v1526_v53  ;;  %2946 = vmatprep.mubr.msk.bf16.mxu1 %vm3692_vm0, %v3690_v6 }
 0x79a   : > { %1937 = vmatprep.subr.bf16.mxu1 %v3221_v45  ;;  %v3264_v45 = vld [vmem:[%s4242_s16 + $0x60] sm:$0xff]  }
 0x7a0   : > { %2947 = vmatmul.mubr.msk.bf16.vlgmr.msra.gmra.mrb[24].mxu1 %vm1138_vm2, %v1524_v56  ;;  %v3229_v56 = vld [vmem:[%s4210_s12 + $0x34] ss:$12 sps:$4 sm:$0xff]  }
 0x7a1   : > { %1969 = vmatprep.mubr.bf16.mxu1 %v3691_v32  ;;  %1938 = vmatpush1.bf16.msra.mxu1 %v3219_v62  ;;  %v3263_v62 = vld [vmem:[%s4242_s16 + $0xa0] sm:$0xff]  }
 0x7a2   : > { %1939 = vmatprep.subr.bf16.mxu1 %v3225_v47  ;;  %v3267_v47 = vld [vmem:[%s4242_s16 + $0x68] sm:$0xff]  }
 0x7a5   : > { %1940 = vmatpush1.bf16.msra.mxu1 %v3223_v48  ;;  %v3266_v48 = vld [vmem:[%s4242_s16 + $0xa8] sm:$0xff]  }
 0x7a6   : > { %1941 = vmatprep.subr.bf16.mxu1 %v3229_v56 }
 0x7a9   : > { %1942 = vmatpush1.bf16.msra.mxu1 %v3227_v57 }
 0x7aa   : > { %1943 = vmatprep.subr.bf16.mxu1 %v3233_v59 }
 0x7ad   : > { %1944 = vmatpush1.bf16.msra.mxu1 %v3231_v60 }
 0x863   : > { %v1323_v32 = vpop.f32.mrb[16].mxu1 }
 0x864   : > { %v2924_v63 = vpop.f32.mrb[17].mxu1 }
 0x865   : > { %v1326_v1 = vpop.f32.mrb[18].mxu1  ;;  %v3235_v63 = vld [vmem:[%s4210_s12 + $0x60] ss:$12 sps:$4 sm:$0xff]  }
 0x866   : > { %v3164_v4 = vpack.i.bf16 %v1326_v1, %v1323_v32  ;;  %v2925_v5 = vpop.f32.mrb[19].mxu1  ;;  %v3237_v32 = vld [vmem:[%s4210_s12 + $0x64] ss:$12 sps:$4 sm:$0xff]   ;;  %v3241_v1 = vld [vmem:[%s4210_s12 + $0x7c] ss:$12 sps:$4 sm:$0xff]  }
 0x867   : > { %1945 = vmatprep.subr.bf16.mxu1 %v3237_v32  ;;  %v3242_v5 = vld [vmem:[%s4210_s12 + $0x80] ss:$12 sps:$4 sm:$0xff]  }
 0x868   : > { %3165 = vrot.lane.b32.xlu1 %v3164_v4, %s3695_s6  ;;  %1946 = vmatpush1.bf16.msra.mxu1 %v3235_v63  ;;  %v3239_v4 = vld [vmem:[%s4210_s12 + $0x78] ss:$12 sps:$4 sm:$0xff]  }
 0x869   : > { %1947 = vmatprep.subr.bf16.mxu1 %v3241_v1 }
 0x86b   : > { %v1444_v8 = vpop.f32.mrb[20].mxu1 }
 0x86c   : > { %v2936_v9 = vpop.f32.mrb[21].mxu1  ;;  %1948 = vmatpush1.bf16.msra.mxu1 %v3239_v4 }
 0x86d   : > { %v1447_v11 = vpop.f32.mrb[22].mxu1  ;;  %v3246_v9 = vld [vmem:[%s4210_s12 + $0x98] ss:$12 sps:$4 sm:$0xff]   ;;  %1949 = vmatprep.subr.bf16.mxu1 %v3245_v7 }
 0x86e   : > { %v3169_v12 = vpack.i.bf16 %v1447_v11, %v1444_v8  ;;  %v2937_v13 = vpop.f32.mrb[23].mxu1  ;;  %v3243_v8 = vld [vmem:[%s4210_s12 + $0x90] ss:$12 sps:$4 sm:$0xff]   ;;  %v3247_v11 = vld [vmem:[%s4210_s12 + $0xa8] ss:$12 sps:$4 sm:$0xff]  }
 0x870   : > { %3170 = vrot.lane.b32.xlu0 %v3169_v12, %s3694_s0  ;;  %1950 = vmatpush1.bf16.msra.mxu1 %v3243_v8  ;;  %v3250_v12 = vld [vmem:[%s4210_s12 + $0xb0] ss:$12 sps:$4 sm:$0xff]  }
 0x871   : > { %1951 = vmatprep.subr.bf16.mxu1 %v3249_v10 }
 0x873   : > { %v1565_v14 = vpop.f32.mrb[24].mxu1 }
 0x874   : > { %v2948_v15 = vpop.f32.mrb[25].mxu1  ;;  %1952 = vmatpush1.bf16.msra.mxu1 %v3247_v11 }
 0x875   : > { %v1568_v16 = vpop.f32.mrb[26].mxu1 }
 0x876   : > { %v3174_v17 = vpack.i.bf16 %v1568_v16, %v1565_v14  ;;  %v2949_v18 = vpop.f32.mrb[27].mxu1 }
 0x878   : > { %3175 = vrot.lane.b32.xlu1 %v3174_v17, %s3693_s14 }
 0x8da   : > { %v3166_v19 = vpop.permute.xlu1 %3165 }
 0x8db   : > { %v3168_v21 = vunpack.i.h.bf16 %v3166_v19  ;;  %v3167_v22 = vunpack.i.l.bf16 %v3166_v19 }
 0x8dd   : > { %v1597_v26 = vsel %vm1090_vm1, %v4360_v42, %v3168_v21  ;;  %v1596_v27 = vsel %vm1090_vm1, %v4358_v39, %v3167_v22  ;;  %v2736_v39 = vld [vmem:[%s779_s21] ss:$0 sm:$0xff] }
 0x8de   : > { %v2745_v21 = vld [vmem:[%s782_s9] ss:$0 sm:$0xff]  ;;  %s4722_s9 = sld [smem:[#allocation25_spill]] }
 0x8e2   : > { %v3171_v20 = vpop.permute.xlu0 %3170 }
 0x8e3   : > { %v3173_v23 = vunpack.i.h.bf16 %v3171_v20  ;;  %v3172_v24 = vunpack.i.l.bf16 %v3171_v20 }
 0x8e4   : > { %p2796_p0 = scmp.eq.s32.totalorder %s4722_s9, 1 }
 0x8e5   : > { %v1600_v30 = vsel %vm1598_vm3, %v1597_v26, %v3173_v23  ;;  %v1599_v31 = vsel %vm1598_vm3, %v1596_v27, %v3172_v24 }
 0x8ea   : > { %v3176_v25 = vpop.permute.xlu1 %3175 }
 0x8eb   : > { %v3178_v28 = vunpack.i.h.bf16 %v3176_v25  ;;  %v3177_v29 = vunpack.i.l.bf16 %v3176_v25  ;;  %v2746_v25 = vld [vmem:[%s4720_s26] ss:$0 sm:$0xff] }
 0x8ed   : > { %v1603_v33 = vsel %vm1601_vm4, %v1600_v30, %v3178_v28  ;;  %v1602_v34 = vsel %vm1601_vm4, %v1599_v31, %v3177_v29  ;;  %v3251_v30 = vld [vmem:[%s4242_s16 + $0x80] sm:$0xff]  }
 0x8ee   : > { %v1604_v35 = vpack.c.bf16 %v1603_v33, %v1602_v34  ;;  %v3252_v31 = vld [vmem:[%s4242_s16 + $0x40] sm:$0xff]   ;;  %v3254_v34 = vld [vmem:[%s4242_s16 + $0x88] sm:$0xff]  }
 0x8ef   : > { %v3253_v33 = vld [vmem:[%s4242_s16] sm:$0xff]   ;;  %2851 = vmatprep.subr.bf16.mxu1 %v3252_v31 }
 0x8f0   : > { %2967 = vmatmul.mubr.bf16.vlgmr.msra.gmra.mrb[12].mxu0 %v1604_v35  ;;  %v3255_v35 = vld [vmem:[%s4242_s16 + $0x48] sm:$0xff]  }
 0x8f1   : > { %2986 = vmatprep.mubr.msk.bf16.mxu0 %vm3692_vm0, %v3690_v6  ;;  %2971 = vmatpush3.bf16.msra.mxu0 %v3222_v46  ;;  %v3265_v46 = vld [vmem:[%s4242_s16 + $0x20] sm:$0xff]  }
 0x8f2   : > { %2972 = vmatprep.subr.bf16.mxu0 %v3690_v6 }
 0x8f5   : > { %2973 = vmatpush3.bf16.msra.mxu0 %v3226_v55 }
 0x8f6   : > { %2974 = vmatprep.subr.bf16.mxu0 %v3690_v6 }
 0x8f9   : > { %2975 = vmatpush3.bf16.msra.mxu0 %v3230_v58  ;;  %v1792_v58 = vld [vmem:[%s4240_s25] sm:$0x7] }
 0x8fa   : > { %2976 = vmatprep.subr.bf16.mxu0 %v3690_v6 }
 0x8fd   : > { %2977 = vmatpush3.bf16.msra.mxu0 %v3234_v61 }
 0x8fe   : > { %2978 = vmatprep.subr.bf16.mxu0 %v3690_v6 }
 0x901   : > { %2979 = vmatpush3.bf16.msra.mxu0 %v3238_v0 }
 0x902   : > { %2980 = vmatprep.subr.bf16.mxu0 %v3690_v6 }
 0x905   : > { %2981 = vmatpush3.bf16.msra.mxu0 %v3242_v5 }
 0x906   : > { %2982 = vmatprep.subr.bf16.mxu0 %v3690_v6 }
 0x909   : > { %2983 = vmatpush3.bf16.msra.mxu0 %v3246_v9 }
 0x90a   : > { %2984 = vmatprep.subr.bf16.mxu0 %v3690_v6 }
 0x90d   : > { %2985 = vmatpush3.bf16.msra.mxu0 %v3250_v12 }
 0x90e   : > { %2990 = vmatprep.subr.bf16.mxu0 %v3690_v6 }
 0x9c3   : > { %v1710_v42 = vpop.f32.mrb[12].mxu0 }
 0x9c4   : > { %v1711_v36 = vadd.f32 %v2736_v39, %v1710_v42  ;;  %v2968_v37 = vpop.f32.mrb[13].mxu0  ;;  %v3257_v42 = vld [vmem:[%s4242_s16 + $0x90] sm:$0xff]  }
 0x9c5   : > { %v1713_v38 = vpop.f32.mrb[14].mxu0  ;;  %v3259_v37 = vld [vmem:[%s4242_s16 + $0x10] sm:$0xff]  }
 0x9c6   : > { %v4421_v40 = vadd.f32 %v1711_v36, %v4254_v2  ;;  %v1714_v41 = vadd.f32 %v2736_v39, %v1713_v38  ;;  %v2969_v43 = vpop.f32.mrb[15].mxu0  ;;  %v3256_v39 = vld [vmem:[%s4242_s16 + $0x8] sm:$0xff]   ;;  %v3258_v36 = vld [vmem:[%s4242_s16 + $0x50] sm:$0xff]   ;;  %v3260_v38 = vld [vmem:[%s4242_s16 + $0x98] sm:$0xff]  }
 0x9c7   : > { %v3262_v43 = vld [vmem:[%s4242_s16 + $0x18] sm:$0xff]  }
 0x9c8   : > { %v4424_v44 = vadd.f32 %v1714_v41, %v4257_v3  ;;  %1721 = vadd.xlane.f32.xlu0 %v4421_v40  ;;  %v3261_v41 = vld [vmem:[%s4242_s16 + $0x58] sm:$0xff]  }
 0x9ca   : > { %1723 = vadd.xlane.f32.xlu1 %v4424_v44 }
 0xa55   : > { %v1722_v2 = vpop.xlane.xlu0 %1721 }
 0xa56   : > { %v1725_v3 = vmul.f32 0.0078125, %v1722_v2  ;;  %v3268_v2 = vld [vmem:[%s4242_s16 + $0x28] sm:$0xff]  }
 0xa57   : > { %v1724_v49 = vpop.xlane.xlu1 %1723 }
 0xa58   : > { %v1727_v50 = vsub.f32 %v4421_v40, %v1725_v3  ;;  %v1726_v51 = vmul.f32 0.0078125, %v1724_v49  ;;  %v3270_v3 = vld [vmem:[%s4242_s16 + $0x70] sm:$0xff]  }
 0xa59   : > { %v3269_v49 = vld [vmem:[%s4242_s16 + $0xb0] sm:$0xff]  }
 0xa5a   : > { %v1728_v52 = vsub.f32 %v4424_v44, %v1726_v51  ;;  %v1729_v53 = vmul.f32 %v1727_v50, %v1727_v50  ;;  %v3273_v51 = vld [vmem:[%s4242_s16 + $0x78] sm:$0xff]  }
 0xa5c   : > { %1731 = vadd.xlane.f32.xlu0 %v1729_v53  ;;  %v1730_v54 = vmul.f32 %v1728_v52, %v1728_v52  ;;  %v3274_v53 = vld [vmem:[%s4242_s16 + $0x38] sm:$0xff]  }
 0xa60   : > { %1733 = vadd.xlane.f32.xlu0 %v1730_v54  ;;  %v1794_v54 = vlaneseq }
 0xa62   : > { %v1795_v55 = vshrl.u32 %v1794_v54, 7 }
 0xa64   : > { %v1796_v56 = vsub.s32 0, %v1795_v55  ;;  %v1804_v57 = vsub.s32 2, %v1795_v55  ;;  %v1800_v59 = vsub.s32 1, %v1795_v55 }
 0xa66   : > { %v1797_v60 = vrot.slane %v1792_v58, %v1796_v56  ;;  %v1805_v61 = vrot.slane %v1792_v58, %v1804_v57  ;;  %v1801_v32 = vrot.slane %v1792_v58, %v1800_v59 }
 0xae9   : > { %v1732_v13 = vpop.xlane.xlu0 %1731 }
 0xaea   : > { %v1735_v14 = vmul.f32 0.0078125, %v1732_v13 }
 0xaec   : > { %v1737_v15 = vadd.f32 1e-05, %v1735_v14 }
 0xaed   : > { %v1734_v16 = vpop.xlane.xlu0 %1733 }
 0xaee   : > { %3311 = vrsqrt.f32 %v1737_v15  ;;  %v1736_v17 = vmul.f32 0.0078125, %v1734_v16 }
 0xaf0   : > { %v1738_v18 = vadd.f32 1e-05, %v1736_v17 }
 0xaf2   : > { %3313 = vrsqrt.f32 %v1738_v18 }
 0xaf8   : > { %v3312_v19 = vpop.eup %3311 }
 0xaf9   : > { %v1741_v20 = vmul.f32 %v3312_v19, %v1727_v50  ;;  %v3271_v50 = vld [vmem:[%s4242_s16 + $0x30] sm:$0xff]  }
 0xafb   : > { %v1749_v24 = vmul.f32 %v2745_v21, %v1741_v20 }
 0xafc   : > { %v3314_v22 = vpop.eup %3313 }
 0xafd   : > { %v1742_v23 = vmul.f32 %v3314_v22, %v1728_v52  ;;  %v1757_v27 = vadd.f32 %v2746_v25, %v1749_v24  ;;  %v3272_v52 = vld [vmem:[%s4242_s16 + $0xb8] sm:$0xff]  }
 0xaff   : > { %v1750_v26 = vmul.f32 %v2745_v21, %v1742_v23 }
 0xb01   : > { %v1758_v28 = vadd.f32 %v2746_v25, %v1750_v26 }
 0xb03   : > { %v1759_v29 = vpack.c.bf16 %v1758_v28, %v1757_v27 }
 0xb05   : > { %1970 = vmatmul.mubr.bf16.vlgmr.msra.gmra.mrb[28].mxu1 %v1759_v29  ;;  %2987 = vmatmul.mubr.bf16.vlgmr.msra.gmra.mrb[16].mxu0 %v1759_v29 }
 0xb06   : > { %3006 = vmatprep.mubr.msk.bf16.mxu0 %vm3692_vm0, %v3690_v6  ;;  %2991 = vmatpush3.bf16.msra.mxu0 %v3251_v30 }
 0xb07   : > { %2992 = vmatprep.subr.bf16.mxu0 %v3690_v6  ;;  %2852 = vmatpush3.bf16.msra.mxu1 %v3253_v33 }
 0xb08   : > { %2853 = vmatprep.subr.bf16.mxu1 %v3255_v35 }
 0xb0a   : > { %2993 = vmatpush3.bf16.msra.mxu0 %v3254_v34 }
 0xb0b   : > { %2994 = vmatprep.subr.bf16.mxu0 %v3690_v6  ;;  %2854 = vmatpush3.bf16.msra.mxu1 %v3256_v39 }
 0xb0c   : > { %2855 = vmatprep.subr.bf16.mxu1 %v3258_v36 }
 0xb0e   : > { %2995 = vmatpush3.bf16.msra.mxu0 %v3257_v42 }
 0xb0f   : > { %2996 = vmatprep.subr.bf16.mxu0 %v3690_v6  ;;  %2856 = vmatpush3.bf16.msra.mxu1 %v3259_v37 }
 0xb10   : > { %2857 = vmatprep.subr.bf16.mxu1 %v3261_v41 }
 0xb12   : > { %2997 = vmatpush3.bf16.msra.mxu0 %v3260_v38 }
 0xb13   : > { %2998 = vmatprep.subr.bf16.mxu0 %v3690_v6  ;;  %2858 = vmatpush3.bf16.msra.mxu1 %v3262_v43 }
 0xb14   : > { %2859 = vmatprep.subr.bf16.mxu1 %v3264_v45 }
 0xb16   : > { %2999 = vmatpush3.bf16.msra.mxu0 %v3263_v62 }
 0xb17   : > { %3000 = vmatprep.subr.bf16.mxu0 %v3690_v6  ;;  %2860 = vmatpush3.bf16.msra.mxu1 %v3265_v46 }
 0xb18   : > { %2861 = vmatprep.subr.bf16.mxu1 %v3267_v47 }
 0xb1a   : > { %3001 = vmatpush3.bf16.msra.mxu0 %v3266_v48 }
 0xb1b   : > { %3002 = vmatprep.subr.bf16.mxu0 %v3690_v6  ;;  %2862 = vmatpush3.bf16.msra.mxu1 %v3268_v2 }
 0xb1c   : > { %2863 = vmatprep.subr.bf16.mxu1 %v3270_v3 }
 0xb1e   : > { %3003 = vmatpush3.bf16.msra.mxu0 %v3269_v49 }
 0xb1f   : > { %3004 = vmatprep.subr.bf16.mxu0 %v3690_v6  ;;  %2864 = vmatpush3.bf16.msra.mxu1 %v3271_v50 }
 0xb20   : > { %2865 = vmatprep.subr.bf16.mxu1 %v3273_v51 }
 0xb22   : > { %3005 = vmatpush3.bf16.msra.mxu0 %v3272_v52 }
 0xb23   : > { %2866 = vmatpush3.bf16.msra.mxu1 %v3274_v53 }
 0xbd8   : > { %v1971_v63 = vpop.f32.mrb[28].mxu1  ;;  %v2014_v0 = vpop.f32.mrb[16].mxu0 }
 0xbd9   : > { %v1972_v1 = vadd.f32 %v1971_v63, %v1797_v60  ;;  %v2015_v4 = vadd.f32 %v2014_v0, %v1805_v61  ;;  %v1973_v5 = vpop.f32.mrb[29].mxu1  ;;  %v2988_v6 = vpop.f32.mrb[17].mxu0 }
 0xbda   : > { %v1974_v7 = vadd.f32 %v1973_v5, %v1801_v32  ;;  %v1975_v8 = vpop.f32.mrb[30].mxu1  ;;  %v2017_v9 = vpop.f32.mrb[18].mxu0 }
 0xbdb   : > { %v2027_v10 = vmul.f32 0.044715, %v1972_v1  ;;  %v2029_v11 = vmul.f32 0.044715, %v2015_v4  ;;  %v1976_v12 = vadd.f32 %v1975_v8, %v1797_v60  ;;  %v2018_v13 = vadd.f32 %v2017_v9, %v1805_v61  ;;  %v1977_v14 = vpop.f32.mrb[31].mxu1  ;;  %v2989_v15 = vpop.f32.mrb[19].mxu0 }
 0xbdc   : > { %v2028_v16 = vmul.f32 0.044715, %v1974_v7  ;;  %v1978_v17 = vadd.f32 %v1977_v14, %v1801_v32  ;;  %v2021_v51 = vmul.f32 0.5, %v1972_v1  ;;  %v2023_v55 = vmul.f32 0.5, %v2015_v4  ;;  %v2771_v15 = vld [vmem:[%s789_s18] ss:$0 sm:$0xff] }
 0xbdd   : > { %v2033_v18 = vmul.f32 %v2027_v10, %v1972_v1  ;;  %v2035_v19 = vmul.f32 %v2029_v11, %v2015_v4  ;;  %v2030_v20 = vmul.f32 0.044715, %v1976_v12  ;;  %v2032_v21 = vmul.f32 0.044715, %v2018_v13 }
 0xbde   : > { %v2034_v22 = vmul.f32 %v2028_v16, %v1974_v7  ;;  %v2031_v23 = vmul.f32 0.044715, %v1978_v17  ;;  %v2024_v52 = vmul.f32 0.5, %v1976_v12  ;;  %v2026_v56 = vmul.f32 0.5, %v2018_v13 }
 0xbdf   : > { %v2039_v24 = vmul.f32 %v2033_v18, %v1972_v1  ;;  %v2041_v25 = vmul.f32 %v2035_v19, %v2015_v4  ;;  %v2036_v26 = vmul.f32 %v2030_v20, %v1976_v12  ;;  %v2038_v27 = vmul.f32 %v2032_v21, %v2018_v13 }
 0xbe0   : > { %v2040_v28 = vmul.f32 %v2034_v22, %v1974_v7  ;;  %v2037_v29 = vmul.f32 %v2031_v23, %v1978_v17  ;;  %v2022_v59 = vmul.f32 0.5, %v1974_v7  ;;  %v2025_v5 = vmul.f32 0.5, %v1978_v17 }
 0xbe1   : > { %v2045_v30 = vadd.f32 %v2039_v24, %v1972_v1  ;;  %v2047_v31 = vadd.f32 %v2041_v25, %v2015_v4  ;;  %v2042_v33 = vmul.f32 %v2036_v26, %v1976_v12  ;;  %v2044_v34 = vmul.f32 %v2038_v27, %v2018_v13 }
 0xbe2   : > { %v2043_v35 = vmul.f32 %v2037_v29, %v1978_v17  ;;  %v2046_v39 = vadd.f32 %v2040_v28, %v1974_v7 }
 0xbe3   : > { %v2051_v42 = vmul.f32 0.7978846, %v2045_v30  ;;  %v2053_v36 = vmul.f32 0.7978846, %v2047_v31  ;;  %v2048_v37 = vadd.f32 %v2042_v33, %v1976_v12  ;;  %v2050_v38 = vadd.f32 %v2044_v34, %v2018_v13 }
 0xbe4   : > { %v2049_v41 = vadd.f32 %v2043_v35, %v1978_v17  ;;  %v2052_v45 = vmul.f32 0.7978846, %v2046_v39 }
 0xbe5   : > { %3315 = vtanh.f32 %v2051_v42  ;;  %v2054_v43 = vmul.f32 0.7978846, %v2048_v37  ;;  %v2056_v62 = vmul.f32 0.7978846, %v2050_v38 }
 0xbe6   : > { %3317 = vtanh.f32 %v2053_v36  ;;  %v2055_v46 = vmul.f32 0.7978846, %v2049_v41 }
 0xbe7   : > { %3319 = vtanh.f32 %v2054_v43 }
 0xbe8   : > { %3321 = vtanh.f32 %v2056_v62 }
 0xbe9   : > { %3323 = vtanh.f32 %v2052_v45 }
 0xbea   : > { %3325 = vtanh.f32 %v2055_v46 }
 0xbef   : > { %v3316_v47 = vpop.eup %3315 }
 0xbf0   : > { %v3318_v48 = vpop.eup %3317  ;;  %v2063_v2 = vadd.f32 1.0, %v3316_v47 }
 0xbf1   : > { %v3320_v3 = vpop.eup %3319  ;;  %v2065_v49 = vadd.f32 1.0, %v3318_v48 }
 0xbf2   : > { %v3322_v50 = vpop.eup %3321  ;;  %v2066_v53 = vadd.f32 1.0, %v3320_v3  ;;  %v2069_v61 = vmul.f32 %v2063_v2, %v2021_v51 }
 0xbf3   : > { %v3324_v54 = vpop.eup %3323  ;;  %v2068_v57 = vadd.f32 1.0, %v3322_v50  ;;  %v2071_v63 = vmul.f32 %v2065_v49, %v2023_v55 }
 0xbf4   : > { %v3326_v58 = vpop.eup %3325  ;;  %v2064_v60 = vadd.f32 1.0, %v3324_v54  ;;  %v2072_v32 = vmul.f32 %v2066_v53, %v2024_v52 }
 0xbf5   : > { %v2074_v0 = vmul.f32 %v2068_v57, %v2026_v56  ;;  %v2067_v6 = vadd.f32 1.0, %v3326_v58 }
 0xbf6   : > { %v2075_v8 = vpack.c.bf16 %v2072_v32, %v2069_v61  ;;  %v2070_v10 = vmul.f32 %v2064_v60, %v2022_v59 }
 0xbf7   : > { %v2077_v9 = vpack.c.bf16 %v2074_v0, %v2071_v63  ;;  %v2073_v1 = vmul.f32 %v2067_v6, %v2025_v5 }
 0xbf9   : > { %3007 = vmatmul.mubr.bf16.vlgmr.msra.gmra.mrb[20].mxu0 %v2077_v9  ;;  %v2076_v11 = vpack.c.bf16 %v2073_v1, %v2070_v10 }
 0xbfb   : > { %2309 = vmatprep.mubr.bf16.mxu1 %v2076_v11 }
 0xbfc   : > { %2310 = vmatmul.mubr.bf16.vlgmr.msra.gmra.mrb[32].mxu1 %v2075_v8 }
 0xccc   : > { %v2352_v4 = vpop.f32.mrb[20].mxu0 }
 0xccd   : > { %v3008_v12 = vpop.f32.mrb[21].mxu0 }
 0xcce   : > { %v2355_v13 = vpop.f32.mrb[22].mxu0 }
 0xccf   : > { %v2867_v7 = vpop.f32.mrb[32].mxu1  ;;  %v3009_v14 = vpop.f32.mrb[23].mxu0 }
 0xcd0   : > { %v2868_v16 = vpop.f32.mrb[33].mxu1 }
 0xcd1   : > { %v2869_v17 = vadd.f32 %v2868_v16, %v2867_v7  ;;  %v2870_v18 = vpop.f32.mrb[34].mxu1 }
 0xcd2   : > { %v2871_v19 = vpop.f32.mrb[35].mxu1 }
 0xcd3   : > { %v2312_v20 = vadd.f32 %v2869_v17, %v2771_v15  ;;  %v2872_v21 = vadd.f32 %v2871_v19, %v2870_v18  ;;  %2364 = sbr.rel (%p2796_p0) target bundleno = 3292 (0xcdc), region = 112 }
 0xcd5   : > { %v2353_v22 = vadd.f32 %v2352_v4, %v2312_v20  ;;  %v2315_v23 = vadd.f32 %v2872_v21, %v2771_v15 }
 0xcd7   : > { %v2359_v24 = vadd.f32 %v2353_v22, %v4421_v40  ;;  %v2356_v25 = vadd.f32 %v2355_v13, %v2315_v23 }
 0xcd9   : > { %v2360_v26 = vadd.f32 %v2356_v25, %v4424_v44  ;;  %2365 = vst [vmem:[%s4246_s13] sm:$0xff] (!%p2796_p0), %v2359_v24 }
 0xcdb   : > { %2366 = vst [vmem:[%s4246_s13 + $0x8] sm:$0xff] %v2360_v26 }
 0xcdc PF: > { %s4723_s18 = sld [smem:[#allocation25_spill]] }
 0xce2   : > { %p2797_p10 = scmp.ne.s32.totalorder %s4723_s18, 1 }
 0xce3   : > { %2373 = vadd.xlane.f32.xlu0 (!%p2797_p10), %v2359_v24  ;;  %s4724_s20 = sld [smem:[#allocation48_spill]] (!%p2797_p10)  ;;  %s4725_s1 = sld [smem:[#allocation49_spill]] (!%p2797_p10) }
 0xce4   : > { %2370 = sbr.rel (%p2797_p10) target bundleno = 3615 (0xe1f), region = 116 }
 0xce7   : > { %2375 = vadd.xlane.f32.xlu0 (!%p2797_p10), %v2360_v26 }
 0xce9   : > { %v2798_v41 = vld [vmem:[%s4724_s20] ss:$0 sm:$0xff] (!%p2797_p10) }
 0xcea   : > { %v2799_v62 = vld [vmem:[%s4725_s1] ss:$0 sm:$0xff] (!%p2797_p10) }
 0xd70   : > { %v2374_v27 = vpop.xlane.xlu0 %2373 }
 0xd71   : > { %v2377_v28 = vmul.f32 0.0078125, %v2374_v27 }
 0xd73   : > { %v2379_v29 = vsub.f32 %v2359_v24, %v2377_v28 }
 0xd74   : > { %v2376_v40 = vpop.xlane.xlu0 %2375 }
 0xd75   : > { %v2378_v30 = vmul.f32 0.0078125, %v2376_v40  ;;  %v2381_v31 = vmul.f32 %v2379_v29, %v2379_v29 }
 0xd77   : > { %v2380_v44 = vsub.f32 %v2360_v26, %v2378_v30  ;;  %2383 = vadd.xlane.f32.xlu1 %v2381_v31 }
 0xd79   : > { %v2382_v33 = vmul.f32 %v2380_v44, %v2380_v44 }
 0xd7b   : > { %2385 = vadd.xlane.f32.xlu1 %v2382_v33 }
 0xe04   : > { %v2384_v34 = vpop.xlane.xlu1 %2383 }
 0xe05   : > { %v2387_v35 = vmul.f32 0.0078125, %v2384_v34 }
 0xe07   : > { %v2389_v39 = vadd.f32 1e-05, %v2387_v35 }
 0xe08   : > { %v2386_v42 = vpop.xlane.xlu1 %2385 }
 0xe09   : > { %3327 = vrsqrt.f32 %v2389_v39  ;;  %v2388_v36 = vmul.f32 0.0078125, %v2386_v42 }
 0xe0b   : > { %v2390_v37 = vadd.f32 1e-05, %v2388_v36 }
 0xe0d   : > { %3329 = vrsqrt.f32 %v2390_v37 }
 0xe13   : > { %v3328_v38 = vpop.eup %3327 }
 0xe14   : > { %v2393_v43 = vmul.f32 %v3328_v38, %v2379_v29 }
 0xe16   : > { %v2401_v45 = vmul.f32 %v2798_v41, %v2393_v43 }
 0xe17   : > { %v3330_v46 = vpop.eup %3329 }
 0xe18   : > { %v2409_v47 = vadd.f32 %v2799_v62, %v2401_v45  ;;  %v2394_v48 = vmul.f32 %v3330_v46, %v2380_v44 }
 0xe1a   : > { %2411 = vst [vmem:[%s4246_s13] sm:$0xff] %v2409_v47  ;;  %v2402_v2 = vmul.f32 %v2798_v41, %v2394_v48 }
 0xe1c   : > { %v2410_v3 = vadd.f32 %v2799_v62, %v2402_v2 }
 0xe1e   : > { %2412 = vst [vmem:[%s4246_s13 + $0x8] sm:$0xff] %v2410_v3 }
 0xe1f PF: > { %s4726_s27 = sld [smem:[#allocation26_spill]]  ;;  %s4727_s11 = sld [smem:[#allocation50_spill]] }
 0xe20   : > { %s2427_s14 = sshll.u32 %s4246_s13, 4  ;;  %s2414_s0 = scalar_lea.sflag [#allocation4], %s4178_s28  ;;  %s4529_s14 = int_to_ptr.vmem [resolvable:$true] %s2427_s14 }
 0xe21   : > { %s3541_s6 = scalar_lea.vmem %s4529_s14, 256  ;;  %p4728_p1 = scmp.ne.s32.totalorder %s4684_s5, 0 }
 0xe22   : > { %p3542_p2 = scmp.ne.s32.totalorder %s4529_s14, %s3541_s6  ;;  %s3696_s4 = smov [#allocation14]  }
 0xe23   : > { %s3545_s24 = sshll.u32 %s3696_s4, 4  ;;  %s3546_s24 = int_to_ptr.vmem [resolvable:$false] %s3545_s24 }
 0xe24   : > { %p3543_p4 = pnand %p3542_p2, %p4728_p1  ;;  %s3547_s30 = scalar_lea.vmem %s3546_s24, 512 }
 0xe25   : > { %s2807_s3 = sshll.u32 %s4726_s27, 8  ;;  %p3548_p6 = scmp.lt.s32.totalorder %s4529_s14, %s3546_s24 }
 0xe26   : > { %s4526_s2 = scalar_lea.hbm %s4727_s11, %s2807_s3  ;;  %p3544_p13 = pneg %p3543_p4 }
 0xe27   : > { %p3549_p7 = scmp.lt.s32.totalorder %s3547_s30, %s3541_s6 }
 0xe29   : > { %p3550_p12 = por %p3549_p7, %p3548_p6 }
 0xe2b   : > { %p3551_p11 = pnand %p3550_p12, %p3544_p13 }
 0xe2d   : > { %3554 = shalt.err (!%p3551_p11)
}
 0xe2e   : > { %s3555_s13 = scalar_lea.hbm %s4526_s2, 256  ;;  %s3559_s22 = scalar_lea.hbm %s4727_s11, 512 }
 0xe2f   : > { %p3556_p5 = scmp.ne.s32.totalorder %s4526_s2, %s3555_s13  ;;  %p3560_p9 = scmp.lt.u32.totalorder %s4526_s2, %s4727_s11 }
 0xe30   : > { %p3561_p0 = scmp.lt.u32.totalorder %s3559_s22, %s3555_s13  ;;  %p3563_p2 = scmp.lt.u32.totalorder %s3555_s13, %s4526_s2 }
 0xe31   : > { %p3557_p8 = pnand %p3556_p5, %p4728_p1 }
 0xe32   : > { %p3562_p10 = por %p3561_p0, %p3560_p9 }
 0xe33   : > { %p3558_p3 = pneg %p3557_p8 }
 0xe34   : > { %p3564_p4 = por %p3563_p2, %p3562_p10 }
 0xe36   : > { %p3565_p13 = pnand %p3564_p4, %p3558_p3 }
 0xe38   : > { %3568 = shalt.err (!%p3565_p13)
}
 0xe39   : > { %s3697_s25 = smov 128   ;;  %s3698_s8 = smov 8  }
 0xe3a   : > { %3032 = dma.vmem_to_hbm [thread:$0]  (%p4728_p1), %s4529_s14, 256, %s4526_s2, %s2414_s0, %s3697_s25, %s3697_s25, %s3698_s8  }
 0xe3b PF: > { %s4729_s9 = sld [smem:[#allocation22_spill]]  ;;  %s4730_s18 = sld [smem:[#allocation34_spill]] }
 0xe3c   : > { %p3061_p6 = scmp.ge.s32.totalorder %s3675_s23, 2 }
 0xe41   : > { %s2442_s29 = sand.u32 1, %s4729_s9   ;;  %p4731_p7 = scmp.ne.s32.totalorder %s4730_s18, 0 }
 0xe42   : > { %s2443_s21 = scalar_lea.sflag [#allocation4], %s2442_s29 }
 0xe43   : > { %p3057_p12 = pnand %p3061_p6, %p4731_p7 }
 0xe45   : > { %3630 = dma.done.wait (!%p3057_p12), %s2443_s21, 256  }
 0xe46   : > { %3632 = vsyncadd (!%p3057_p12), %s2443_s21, 4294967040  ;;  %s39_s23 = sadd.s32 1, %s3675_s23   ;;  %s4732_s29 = sld [smem:[#allocation20_spill]] }
 0xe47   : > { %p36_p11 = scmp.ge.s32.totalorder %s39_s23, 6   ;;  %s4733_s30 = sld [smem:[#allocation21_spill]] }
 0xe48   : > { %s4734_s15 = sld [smem:[#allocation31_spill]]  ;;  %s4735_s16 = sld [smem:[#allocation23_spill]] }
 0xe49   : > { %s4736_s17 = sld [smem:[#allocation24_spill]]  ;;  %s4737_s18 = sld [smem:[#allocation35_spill]] }
 0xe4a   : > { %s4738_s19 = sld [smem:[#allocation27_spill]]  ;;  %s4739_s20 = sld [smem:[#allocation28_spill]] }
 0xe4b   : > { %s4740_s21 = sld [smem:[#allocation29_spill]]  ;;  %s4741_s22 = sld [smem:[#allocation33_spill]] }
 0xe4c   :  { %38 = sbr.rel (!%p36_p11) target bundleno = 31 (0x1f), region = 220 }
 0xe53   :  { %2448 = vsyncpa [#allocation3], 1 }
 0xe54   :  { %2450 = vsyncpa [#allocation3 + $0x1], 1 }
 0xe55   :  { %2451 = vsyncpa [#allocation6], 1 }
 0xe56   :  { %2453 = vsyncpa [#allocation6 + $0x1], 1 }
 0xe57   :  { %2454 = vsyncpa [#allocation9], 1 }
 0xe58   :  { %2456 = vsyncpa [#allocation9 + $0x1], 1 }
 0xe59   :  { %2457 = vsyncpa [#allocation12], 1 }
 0xe5a   :  { %2459 = vsyncpa [#allocation12 + $0x1], 1 }
 0xe5b   :  { %2460 = vsyncpa [#allocation4], 1 }
 0xe5c   :  { %2462 = vsyncpa [#allocation4 + $0x1], 1 }

</bundles_post_ra>
